<compile_context>
chip_gen: v6e
topology: v6e:2x2x1
jax: 0.10.0
libtpu: 0.0.40
codegen_flags: <defaults>
</compile_context>

<pallas_src>
import jax
import jax.numpy as jnp
from jax import lax
from jax.experimental import pallas as pl
from jax.experimental.pallas import tpu as pltpu

BN_EPS = 1e-5


def _round_up(a, m):
    return (a + m - 1) // m * m


# ---------------------------------------------------------------------------
# Kernel: one batch tile of FineTuneBlock2 with BN pre-folded into the linears.
# ---------------------------------------------------------------------------
def finetune_block2_kernel(x_ref, w1_ref, w2_ref, w3a_ref, w3b_ref, w4_ref,
                           bias_ref, y_ref):
    xb = x_ref[...]                              # (TB, K) bf16, K = input_size

    # packed biases: [b1 | b2+BN1fold | b3+BN2fold | b4+BN3fold (lane padded)]
    b1 = bias_ref[:, 0:512]
    b2 = bias_ref[:, 512:768]
    b3 = bias_ref[:, 768:896]
    b4 = bias_ref[:, 896:]

    # fc1 -> ReLU   (dropout eval = identity; BN1 folded into w2/b2)
    h1 = jnp.dot(xb, w1_ref[...], preferred_element_type=jnp.float32) + b1
    h1 = jnp.maximum(h1, 0.0)

    # fc2 -> ReLU   (BN2 folded into w3a/b3)
    h2 = jnp.dot(h1.astype(jnp.bfloat16), w2_ref[...],
                 preferred_element_type=jnp.float32) + b2
    h2 = jnp.maximum(h2, 0.0)

    # residual = cat([BN2(h2), x]); fc3(residual) == h2 @ w3a' + x @ w3b + b3'
    h3 = (jnp.dot(h2.astype(jnp.bfloat16), w3a_ref[...],
                  preferred_element_type=jnp.float32)
          + jnp.dot(xb, w3b_ref[...], preferred_element_type=jnp.float32)
          + b3)
    h3 = jnp.maximum(h3, 0.0)

    # fc4 (BN3 folded into w4/b4), lane-padded output dim, bf16 store
    y = jnp.dot(h3.astype(jnp.bfloat16), w4_ref[...],
                preferred_element_type=jnp.float32) + b4
    y_ref[...] = y.astype(y_ref.dtype)


# ---------------------------------------------------------------------------
# Parameter prep: fold BN (eval) into following linears, pad, pack, cast bf16.
# ---------------------------------------------------------------------------
def prepare_params(raw, input_size, n_classes):
    (w1, b1, g1, bt1, rm1, rv1,
     w2, b2, g2, bt2, rm2, rv2,
     w3, b3, g3, bt3, rm3, rv3,
     w4, b4) = raw

    # Fail loudly if the hard-coded widths (512/256/128) behind the bias-pack
    # offsets and the w3 row-split are violated.
    assert w1.shape == (input_size, 512), w1.shape
    assert w2.shape == (512, 256), w2.shape
    assert w3.shape == (256 + input_size, 128), w3.shape
    assert w4.shape == (128, n_classes), w4.shape

    ncp = _round_up(n_classes, 128)          # padded logits lane dim

    def bn_affine(g, bt, rm, rv):            # eval BN as y = x*scale + shift
        scale = g * lax.rsqrt(rv + BN_EPS)
        shift = bt - rm * scale
        return scale, shift

    s1, t1 = bn_affine(g1, bt1, rm1, rv1)    # (1, 512)
    s2, t2 = bn_affine(g2, bt2, rm2, rv2)    # (1, 256)
    s3, t3 = bn_affine(g3, bt3, rm3, rv3)    # (1, 128)

    # fold BN1 -> fc2, BN2 -> fc3 (h2 rows only), BN3 -> fc4   (all f32)
    w2f = s1.reshape(-1, 1) * w2
    b2f = b2 + t1 @ w2
    w3a = s2.reshape(-1, 1) * w3[:256]       # rows multiplying BN2(h2)
    b3f = b3 + t2 @ w3[:256]
    w3b = w3[256:]                           # rows multiplying raw x (K=input_size)
    w4f = s3.reshape(-1, 1) * w4
    b4f = b4 + t3 @ w4

    # lane-pad only the fc4 output dim (dense unmasked stores)
    w4p = jnp.pad(w4f, ((0, 0), (0, ncp - n_classes)))
    b4p = jnp.pad(b4f, ((0, 0), (0, ncp - n_classes)))

    bias = jnp.concatenate([b1, b2f, b3f, b4p], axis=1)   # (1, 896 + ncp)
    assert bias.shape == (1, 896 + ncp), bias.shape

    bf16 = jnp.bfloat16
    return dict(
        w1=w1.astype(bf16),                  # (K, 512)  K = input_size (no pad)
        w2=w2f.astype(bf16),                 # (512, 256)
        w3a=w3a.astype(bf16),                # (256, 128)
        w3b=w3b.astype(bf16),                # (K, 128)
        w4=w4p.astype(bf16),                 # (128, ncp)
        bias=bias.astype(jnp.float32),       # (1, 896 + ncp)
        ncp=ncp,
    )


# ---------------------------------------------------------------------------
# Batch-tile heuristic:
#   * multiple of 16 always (bf16 sublane packing)
#   * floor 128 rows (MXU M-utilization on v5e), cap 1024 (v7x VMEM-safe)
#   * for large B, split so the grid has >= 2 "parallel" steps (v7x 2nd TC)
# ---------------------------------------------------------------------------
def _choose_batch_tile(B):
    b16 = _round_up(B, 16)
    if b16 <= 256:
        return max(b16, 128)                 # single tile
    half = _round_up((b16 + 1) // 2, 128)    # >= 2 grid steps, 128-aligned
    return min(half, 1024)


# ---------------------------------------------------------------------------
# Wrapper: batch grid, weights resident across batch tiles.
# ---------------------------------------------------------------------------
def finetune_block2(x, prepared, n_classes):
    B, in_features = x.shape
    ncp = prepared["ncp"]
    nbias = prepared["bias"].shape[1]

    tb = _choose_batch_tile(B)
    bp = _round_up(B, tb)
    xp = jnp.pad(x.astype(jnp.bfloat16), ((0, bp - B), (0, 0)))

    y = pl.pallas_call(
        finetune_block2_kernel,
        out_shape=jax.ShapeDtypeStruct((bp, ncp), jnp.bfloat16),
        grid=(bp // tb,),
        in_specs=[
            pl.BlockSpec((tb, in_features), lambda i: (i, 0)),    # x (batch-blocked, bf16)
            pl.BlockSpec((in_features, 512), lambda i: (0, 0)),   # w1   (resident)
            pl.BlockSpec((512, 256), lambda i: (0, 0)),           # w2   (resident)
            pl.BlockSpec((256, 128), lambda i: (0, 0)),           # w3a  (resident)
            pl.BlockSpec((in_features, 128), lambda i: (0, 0)),   # w3b  (resident)
            pl.BlockSpec((128, ncp), lambda i: (0, 0)),           # w4   (resident)
            pl.BlockSpec((1, nbias), lambda i: (0, 0)),           # packed biases
        ],
        out_specs=pl.BlockSpec((tb, ncp), lambda i: (i, 0)),
        compiler_params=pltpu.CompilerParams(
            dimension_semantics=("parallel",)),
    )(xp, prepared["w1"], prepared["w2"], prepared["w3a"],
      prepared["w3b"], prepared["w4"], prepared["bias"])

    return y[:B, :n_classes].astype(jnp.float32)


# ---------------------------------------------------------------------------
# Deterministic init + pure-JAX reference check.
# ---------------------------------------------------------------------------
def _linear_params(key, fan_in, fan_out):
    """PyTorch nn.Linear default init; weight stored [in, out]."""
    kw, kb = jax.random.split(key)
    bound = 1.0 / (fan_in ** 0.5)
    w = jax.random.uniform(kw, (fan_in, fan_out), jnp.float32, -bound, bound)
    b = jax.random.uniform(kb, (1, fan_out), jnp.float32, -bound, bound)
    return w, b


def _bn_params(key, n):
    """Non-trivial eval-mode BN stats so the fold is actually exercised."""
    kg, kb, km, kv = jax.random.split(key, 4)
    g = jax.random.uniform(kg, (1, n), jnp.float32, 0.5, 1.5)
    bt = 0.1 * jax.random.normal(kb, (1, n), jnp.float32)
    rm = 0.1 * jax.random.normal(km, (1, n), jnp.float32)
    rv = jax.random.uniform(kv, (1, n), jnp.float32, 0.5, 1.5)
    return g, bt, rm, rv


def _reference(x, raw):
    (w1, b1, g1, bt1, rm1, rv1,
     w2, b2, g2, bt2, rm2, rv2,
     w3, b3, g3, bt3, rm3, rv3,
     w4, b4) = raw

    def bn(h, g, bt, rm, rv):
        return (h - rm) * lax.rsqrt(rv + BN_EPS) * g + bt

    h = jnp.maximum(x @ w1 + b1, 0.0)        # Dropout (eval) = identity
    h = bn(h, g1, bt1, rm1, rv1)
    h = jnp.maximum(h @ w2 + b2, 0.0)
    h = bn(h, g2, bt2, rm2, rv2)
    r = jnp.concatenate([h, x], axis=1)
    h = jnp.maximum(r @ w3 + b3, 0.0)
    h = bn(h, g3, bt3, rm3, rv3)
    return h @ w4 + b4


if __name__ == "__main__":
    B, INPUT_SIZE, N_CLASSES = 8, 32, 10

    root = jax.random.PRNGKey(0)
    (k_x, k_x2, k_fc1, k_fc2, k_fc3, k_fc4,
     k_bn1, k_bn2, k_bn3) = jax.random.split(root, 9)

    x = jax.random.normal(k_x, (B, INPUT_SIZE), jnp.float32)

    w1, b1 = _linear_params(k_fc1, INPUT_SIZE, 512)
    g1, bt1, rm1, rv1 = _bn_params(k_bn1, 512)
    w2, b2 = _linear_params(k_fc2, 512, 256)
    g2, bt2, rm2, rv2 = _bn_params(k_bn2, 256)
    w3, b3 = _linear_params(k_fc3, 256 + INPUT_SIZE, 128)
    g3, bt3, rm3, rv3 = _bn_params(k_bn3, 128)
    w4, b4 = _linear_params(k_fc4, 128, N_CLASSES)

    raw = (w1, b1, g1, bt1, rm1, rv1,
           w2, b2, g2, bt2, rm2, rv2,
           w3, b3, g3, bt3, rm3, rv3,
           w4, b4)

    prepared = prepare_params(raw, INPUT_SIZE, N_CLASSES)

    # --- small batch (single tile) -----------------------------------------
    logits = finetune_block2(x, prepared, N_CLASSES)
    jax.block_until_ready(logits)

    ref = _reference(x, raw)
    assert logits.shape == (B, N_CLASSES)
    # bf16 weights/activations + BN fold -> compare against the f32 sequential
    # reference with a relaxed (inference-appropriate) tolerance.
    assert jnp.allclose(logits, ref, atol=5e-2, rtol=5e-2), (
        float(jnp.max(jnp.abs(logits - ref))))

    # --- larger, non-multiple batch (exercises the multi-tile grid path) ----
    B2 = 300
    x2 = jax.random.normal(k_x2, (B2, INPUT_SIZE), jnp.float32)
    logits2 = finetune_block2(x2, prepared, N_CLASSES)
    jax.block_until_ready(logits2)

    ref2 = _reference(x2, raw)
    assert logits2.shape == (B2, N_CLASSES)
    assert jnp.allclose(logits2, ref2, atol=5e-2, rtol=5e-2), (
        float(jnp.max(jnp.abs(logits2 - ref2))))

    print("KERNEL_OK")
</pallas_src>

<mosaic_0001>
module attributes {stable_mosaic.version = 11 : i64} {
  func.func @finetune_block2_kernel(%arg0: i32, %arg1: memref<128x32xbf16, #tpu.memory_space<vmem>>, %arg2: memref<32x512xbf16, #tpu.memory_space<vmem>>, %arg3: memref<512x256xbf16, #tpu.memory_space<vmem>>, %arg4: memref<256x128xbf16, #tpu.memory_space<vmem>>, %arg5: memref<32x128xbf16, #tpu.memory_space<vmem>>, %arg6: memref<128x128xbf16, #tpu.memory_space<vmem>>, %arg7: memref<1x1024xf32, #tpu.memory_space<vmem>>, %arg8: memref<128x128xbf16, #tpu.memory_space<vmem>>) attributes {dimension_semantics = [#tpu.dimension_semantics<parallel>], iteration_bounds = array<i64: 1>, scalar_prefetch = 0 : i64, scratch_operands = 0 : i64, tpu.core_type = #tpu.core_type<tc>, window_params = [{transform_indices = @transform_0, window_bounds = array<i64: 128, 32>}, {pipeline_mode = #tpu.pipeline_mode<synchronous>, transform_indices = @transform_1, window_bounds = array<i64: 32, 512>}, {pipeline_mode = #tpu.pipeline_mode<synchronous>, transform_indices = @transform_2, window_bounds = array<i64: 512, 256>}, {pipeline_mode = #tpu.pipeline_mode<synchronous>, transform_indices = @transform_3, window_bounds = array<i64: 256, 128>}, {pipeline_mode = #tpu.pipeline_mode<synchronous>, transform_indices = @transform_4, window_bounds = array<i64: 32, 128>}, {pipeline_mode = #tpu.pipeline_mode<synchronous>, transform_indices = @transform_5, window_bounds = array<i64: 128, 128>}, {pipeline_mode = #tpu.pipeline_mode<synchronous>, transform_indices = @transform_6, window_bounds = array<i64: 1, 1024>}, {transform_indices = @transform_7, window_bounds = array<i64: 128, 128>}]} {
    %c0 = arith.constant 0 : index
    %c0_0 = arith.constant 0 : index
    %0 = vector.load %arg1[%c0, %c0_0] : memref<128x32xbf16, #tpu.memory_space<vmem>>, vector<128x32xbf16>
    %c0_1 = arith.constant 0 : index
    %c0_2 = arith.constant 0 : index
    %1 = vector.load %arg7[%c0_1, %c0_2] : memref<1x1024xf32, #tpu.memory_space<vmem>>, vector<1x512xf32>
    %c0_3 = arith.constant 0 : index
    %c512 = arith.constant 512 : index
    %2 = vector.load %arg7[%c0_3, %c512] : memref<1x1024xf32, #tpu.memory_space<vmem>>, vector<1x256xf32>
    %c0_4 = arith.constant 0 : index
    %c768 = arith.constant 768 : index
    %3 = vector.load %arg7[%c0_4, %c768] : memref<1x1024xf32, #tpu.memory_space<vmem>>, vector<1x128xf32>
    %c0_5 = arith.constant 0 : index
    %c896 = arith.constant 896 : index
    %4 = vector.load %arg7[%c0_5, %c896] : memref<1x1024xf32, #tpu.memory_space<vmem>>, vector<1x128xf32>
    %c0_6 = arith.constant 0 : index
    %c0_7 = arith.constant 0 : index
    %5 = vector.load %arg2[%c0_6, %c0_7] : memref<32x512xbf16, #tpu.memory_space<vmem>>, vector<32x512xbf16>
    %cst = arith.constant dense<0.000000e+00> : vector<128x512xf32>
    %6 = tpu.matmul %0, %5, %cst {dimension_numbers = #tpu.dot_dimension_numbers<[1], [0], [0], [1], [0, 0, 1, 1], [], []>} : vector<128x32xbf16>, vector<32x512xbf16>, vector<128x512xf32> -> vector<128x512xf32>
    %7 = vector.broadcast %1 : vector<1x512xf32> to vector<128x512xf32>
    %8 = arith.addf %6, %7 : vector<128x512xf32>
    %cst_8 = arith.constant 0.000000e+00 : f32
    %9 = vector.broadcast %cst_8 : f32 to vector<128x512xf32>
    %10 = arith.maximumf %8, %9 : vector<128x512xf32>
    %11 = arith.truncf %10 : vector<128x512xf32> to vector<128x512xbf16>
    %c0_9 = arith.constant 0 : index
    %c0_10 = arith.constant 0 : index
    %12 = vector.load %arg3[%c0_9, %c0_10] : memref<512x256xbf16, #tpu.memory_space<vmem>>, vector<512x256xbf16>
    %cst_11 = arith.constant dense<0.000000e+00> : vector<128x256xf32>
    %13 = tpu.matmul %11, %12, %cst_11 {dimension_numbers = #tpu.dot_dimension_numbers<[1], [0], [0], [1], [0, 0, 1, 1], [], []>} : vector<128x512xbf16>, vector<512x256xbf16>, vector<128x256xf32> -> vector<128x256xf32>
    %14 = vector.broadcast %2 : vector<1x256xf32> to vector<128x256xf32>
    %15 = arith.addf %13, %14 : vector<128x256xf32>
    %cst_12 = arith.constant 0.000000e+00 : f32
    %16 = vector.broadcast %cst_12 : f32 to vector<128x256xf32>
    %17 = arith.maximumf %15, %16 : vector<128x256xf32>
    %18 = arith.truncf %17 : vector<128x256xf32> to vector<128x256xbf16>
    %c0_13 = arith.constant 0 : index
    %c0_14 = arith.constant 0 : index
    %19 = vector.load %arg4[%c0_13, %c0_14] : memref<256x128xbf16, #tpu.memory_space<vmem>>, vector<256x128xbf16>
    %cst_15 = arith.constant dense<0.000000e+00> : vector<128x128xf32>
    %20 = tpu.matmul %18, %19, %cst_15 {dimension_numbers = #tpu.dot_dimension_numbers<[1], [0], [0], [1], [0, 0, 1, 1], [], []>} : vector<128x256xbf16>, vector<256x128xbf16>, vector<128x128xf32> -> vector<128x128xf32>
    %c0_16 = arith.constant 0 : index
    %c0_17 = arith.constant 0 : index
    %21 = vector.load %arg5[%c0_16, %c0_17] : memref<32x128xbf16, #tpu.memory_space<vmem>>, vector<32x128xbf16>
    %cst_18 = arith.constant dense<0.000000e+00> : vector<128x128xf32>
    %22 = tpu.matmul %0, %21, %cst_18 {dimension_numbers = #tpu.dot_dimension_numbers<[1], [0], [0], [1], [0, 0, 1, 1], [], []>} : vector<128x32xbf16>, vector<32x128xbf16>, vector<128x128xf32> -> vector<128x128xf32>
    %23 = arith.addf %20, %22 : vector<128x128xf32>
    %24 = vector.broadcast %3 : vector<1x128xf32> to vector<128x128xf32>
    %25 = arith.addf %23, %24 : vector<128x128xf32>
    %cst_19 = arith.constant 0.000000e+00 : f32
    %26 = vector.broadcast %cst_19 : f32 to vector<128x128xf32>
    %27 = arith.maximumf %25, %26 : vector<128x128xf32>
    %28 = arith.truncf %27 : vector<128x128xf32> to vector<128x128xbf16>
    %c0_20 = arith.constant 0 : index
    %c0_21 = arith.constant 0 : index
    %29 = vector.load %arg6[%c0_20, %c0_21] : memref<128x128xbf16, #tpu.memory_space<vmem>>, vector<128x128xbf16>
    %cst_22 = arith.constant dense<0.000000e+00> : vector<128x128xf32>
    %30 = tpu.matmul %28, %29, %cst_22 {dimension_numbers = #tpu.dot_dimension_numbers<[1], [0], [0], [1], [0, 0, 1, 1], [], []>} : vector<128x128xbf16>, vector<128x128xbf16>, vector<128x128xf32> -> vector<128x128xf32>
    %31 = vector.broadcast %4 : vector<1x128xf32> to vector<128x128xf32>
    %32 = arith.addf %30, %31 : vector<128x128xf32>
    %33 = arith.truncf %32 : vector<128x128xf32> to vector<128x128xbf16>
    %c0_23 = arith.constant 0 : index
    %c0_24 = arith.constant 0 : index
    %34 = vector.load %arg8[%c0_23, %c0_24] : memref<128x128xbf16, #tpu.memory_space<vmem>>, vector<128x128xbf16>
    tpu.vector_store %arg8[%c0_23, %c0_24], %33 {strides = array<i32>} : memref<128x128xbf16, #tpu.memory_space<vmem>>, vector<128x128xbf16>,
    return
  }
  func.func @transform_0(%arg0: i32) -> (i32, i32) {
    %c0_i32 = arith.constant 0 : i32
    %c0_i32_0 = arith.constant 0 : i32
    return %arg0, %c0_i32 : i32, i32
  }
  func.func @transform_1(%arg0: i32) -> (i32, i32) {
    %c0_i32 = arith.constant 0 : i32
    %c0_i32_0 = arith.constant 0 : i32
    %c0_i32_1 = arith.constant 0 : i32
    return %c0_i32, %c0_i32_0 : i32, i32
  }
  func.func @transform_2(%arg0: i32) -> (i32, i32) {
    %c0_i32 = arith.constant 0 : i32
    %c0_i32_0 = arith.constant 0 : i32
    %c0_i32_1 = arith.constant 0 : i32
    return %c0_i32, %c0_i32_0 : i32, i32
  }
  func.func @transform_3(%arg0: i32) -> (i32, i32) {
    %c0_i32 = arith.constant 0 : i32
    %c0_i32_0 = arith.constant 0 : i32
    %c0_i32_1 = arith.constant 0 : i32
    return %c0_i32, %c0_i32_0 : i32, i32
  }
  func.func @transform_4(%arg0: i32) -> (i32, i32) {
    %c0_i32 = arith.constant 0 : i32
    %c0_i32_0 = arith.constant 0 : i32
    %c0_i32_1 = arith.constant 0 : i32
    return %c0_i32, %c0_i32_0 : i32, i32
  }
  func.func @transform_5(%arg0: i32) -> (i32, i32) {
    %c0_i32 = arith.constant 0 : i32
    %c0_i32_0 = arith.constant 0 : i32
    %c0_i32_1 = arith.constant 0 : i32
    return %c0_i32, %c0_i32_0 : i32, i32
  }
  func.func @transform_6(%arg0: i32) -> (i32, i32) {
    %c0_i32 = arith.constant 0 : i32
    %c0_i32_0 = arith.constant 0 : i32
    %c0_i32_1 = arith.constant 0 : i32
    return %c0_i32, %c0_i32_0 : i32, i32
  }
  func.func @transform_7(%arg0: i32) -> (i32, i32) {
    %c0_i32 = arith.constant 0 : i32
    %c0_i32_0 = arith.constant 0 : i32
    return %arg0, %c0_i32 : i32, i32
  }
}

</mosaic_0001>

<bundles_post_ra>
// kernel: tpu_custom_call.1
= control target key start
LH: loop header
LB: loop body
LE: loop exit
PB: predicated region body
PF: predicated region fallthrough
CT: control target
= control target key end

     0   :  { %12 = vsyncpa [#allocation3], 0  ;;  %s2809_s0 = inlined_call_operand.vmem [shape: bf16[128,32], index: 0, kind: input, shape index: {}]   ;;  %s2810_s1 = inlined_call_operand.vmem [shape: bf16[32,512], index: 1, kind: input, shape index: {}]   ;;  %s2811_s2 = inlined_call_operand.hbm [shape: bf16[512,256], index: 2, kind: input, shape index: {}]   ;;  %s2812_s3 = inlined_call_operand.hbm [shape: bf16[256,128], index: 3, kind: input, shape index: {}]   ;;  %s2813_s4 = inlined_call_operand.vmem [shape: bf16[32,128], index: 4, kind: input, shape index: {}]   ;;  %s2814_s5 = inlined_call_operand.hbm [shape: bf16[128,128], index: 5, kind: input, shape index: {}]   ;;  %s2815_s6 = inlined_call_operand.vmem [shape: f32[1,1024], index: 6, kind: input, shape index: {}]   ;;  %s2816_s7 = inlined_call_operand.hbm [shape: bf16[128,128], index: 7, kind: output, shape index: {}]  }
   0x1   :  { %13 = vsyncpa [#allocation6], 0 }
   0x2   :  { %14 = vsyncpa [#allocation4], 0  ;;  %s2457_s24 = smov [#allocation5]  }
   0x3   :  { %s36_s25 = sshll.u32 %s2457_s24, 4  ;;  %s37_s25 = int_to_ptr.vmem [resolvable:$true] %s36_s25 }
   0x4   :  { %s2379_s26 = scalar_lea.vmem %s37_s25, 2048  ;;  %p2384_p1 = scmp.lt.s32.totalorder %s37_s25, %s37_s25 }
   0x5   :  { %p2380_p0 = scmp.ne.s32.totalorder %s37_s25, %s2379_s26  ;;  %p2385_p2 = scmp.lt.s32.totalorder %s2379_s26, %s2379_s26 }
   0x7   :  { %p2386_p3 = por %p2385_p2, %p2384_p1 }
   0x9   :  { %p2387_p4 = pnand %p2386_p3, %p2380_p0 }
   0xb   :  { %2390 = shalt.err (!%p2387_p4)
}
   0xc   :  { %s2458_s27 = smov 64   ;;  %s2459_s28 = smov 4  }
   0xd   :  { %42 = dma.hbm_to_vmem [thread:$0]  %s2812_s3, 2048, %s37_s25, [#allocation6], %s2458_s27, %s2458_s27, %s2459_s28  }
   0xe   :  { %s2460_s8 = smov [#allocation2]  }
   0xf   :  { %s24_s9 = sshll.u32 %s2460_s8, 4  ;;  %s25_s9 = int_to_ptr.vmem [resolvable:$true] %s24_s9 }
  0x10   :  { %s2399_s10 = scalar_lea.vmem %s25_s9, 8192  ;;  %p2404_p6 = scmp.lt.s32.totalorder %s25_s9, %s25_s9 }
  0x11   :  { %p2400_p5 = scmp.ne.s32.totalorder %s25_s9, %s2399_s10  ;;  %p2405_p7 = scmp.lt.s32.totalorder %s2399_s10, %s2399_s10 }
  0x13   :  { %p2406_p8 = por %p2405_p7, %p2404_p6 }
  0x15   :  { %p2407_p9 = pnand %p2406_p8, %p2400_p5 }
  0x17   :  { %2410 = shalt.err (!%p2407_p9)
}
  0x18   :  { %s2461_s11 = smov 128   ;;  %s2462_s12 = smov 8  }
  0x19   :  { %30 = dma.hbm_to_vmem [thread:$0]  %s2811_s2, 8192, %s25_s9, [#allocation3], %s2461_s11, %s2461_s11, %s2462_s12  }
  0x1a   :  { %s2463_s15 = smov [#allocation7]  }
  0x1b   :  { %s50_s16 = sshll.u32 %s2463_s15, 4  ;;  %s51_s16 = int_to_ptr.vmem [resolvable:$true] %s50_s16 }
  0x1c   :  { %s2419_s3 = scalar_lea.vmem %s51_s16, 1024  ;;  %p2424_p11 = scmp.lt.s32.totalorder %s51_s16, %s51_s16 }
  0x1d   :  { %p2420_p10 = scmp.ne.s32.totalorder %s51_s16, %s2419_s3  ;;  %p2425_p12 = scmp.lt.s32.totalorder %s2419_s3, %s2419_s3 }
  0x1f   :  { %p2426_p13 = por %p2425_p12, %p2424_p11 }
  0x21   :  { %p2427_p0 = pnand %p2426_p13, %p2420_p10 }
  0x23   :  { %2430 = shalt.err (!%p2427_p0)
}
  0x24   :  { %56 = dma.hbm_to_vmem [thread:$0]  %s2814_s5, 1024, %s51_s16, [#allocation6], %s2458_s27, %s2458_s27, %s2459_s28  }
  0x25   :  { %2451 = dma.done.wait [#allocation3], 8192  }
  0x26   :  { %2452 = vsyncadd [#allocation3], 4294959104 }
  0x27   :  { %2453 = dma.done.wait [#allocation6], 3072  }
  0x28   :  { %2454 = vsyncadd [#allocation6], 4294964224  ;;  %v2464_v0 = vmov 0   ;;  %v2225_v1 = vld [vmem:[%s2810_s1 + $0x24] ss:$16 sps:$4 sm:$0xff]   ;;  %vm198_vm0 = vcmask 261120  }
  0x29   :  { %255 = vmatprep.mubr.bf16.mxu0 %v2464_v0  ;;  %368 = vmatprep.mubr.bf16.mxu1 %v2464_v0  ;;  %v2227_v2 = vld [vmem:[%s2810_s1 + $0x2c] ss:$16 sps:$4 sm:$0xff]   ;;  %v2229_v3 = vld [vmem:[%s2810_s1 + $0x20] ss:$16 sps:$4 sm:$0xff]   ;;  %v2230_v4 = vld [vmem:[%s2810_s1 + $0x28] ss:$16 sps:$4 sm:$0xff]  }
  0x2a   :  { %235 = vmatprep.subr.bf16.mxu0 %v2225_v1  ;;  %348 = vmatprep.subr.bf16.mxu1 %v2227_v2  ;;  %v2231_v5 = vld [vmem:[%s2810_s1 + $0x4] ss:$16 sps:$4 sm:$0xff]   ;;  %v2233_v6 = vld [vmem:[%s2810_s1 + $0xc] ss:$16 sps:$4 sm:$0xff]   ;;  %v2235_v7 = vld [vmem:[%s2810_s1] ss:$16 sps:$4 sm:$0xff]  }
  0x2b   :  { %236 = vmatpush1.bf16.msra.mxu0 %v2229_v3  ;;  %349 = vmatpush1.bf16.msra.mxu1 %v2230_v4  ;;  %v2236_v8 = vld [vmem:[%s2810_s1 + $0x8] ss:$16 sps:$4 sm:$0xff]   ;;  %v2237_v9 = vld [vmem:[%s2809_s0] sm:$0xff]   ;;  %v2247_v12 = vld [vmem:[#allocation2 + $0x74] ss:$8 sps:$4 sm:$0xff]  }
  0x2c   :  { %237 = vmatprep.subr.bf16.mxu0 %v2231_v5  ;;  %350 = vmatprep.subr.bf16.mxu1 %v2233_v6  ;;  %v2238_v10 = vld [vmem:[%s2809_s0 + $0x8] sm:$0xff]   ;;  %v2245_v11 = vld [vmem:[#allocation2 + $0x70] ss:$8 sps:$4 sm:$0xff]   ;;  %v2250_v14 = vld [vmem:[#allocation2 + $0x174] ss:$8 sps:$4 sm:$0xff]  }
  0x2d   :  { %v2248_v13 = vld [vmem:[#allocation2 + $0x170] ss:$8 sps:$4 sm:$0xff]   ;;  %v2251_v15 = vld [vmem:[#allocation2 + $0x60] ss:$8 sps:$4 sm:$0xff]   ;;  %v2253_v16 = vld [vmem:[#allocation2 + $0x64] ss:$8 sps:$4 sm:$0xff]  }
  0x2e   :  { %v2254_v17 = vld [vmem:[#allocation2 + $0x160] ss:$8 sps:$4 sm:$0xff]   ;;  %v2256_v18 = vld [vmem:[#allocation2 + $0x164] ss:$8 sps:$4 sm:$0xff]   ;;  %v2259_v19 = vld [vmem:[#allocation2 + $0x54] ss:$8 sps:$4 sm:$0xff]  }
  0x2f   :  { %238 = vmatpush1.bf16.msra.mxu0 %v2235_v7  ;;  %351 = vmatpush1.bf16.msra.mxu1 %v2236_v8  ;;  %v2262_v20 = vld [vmem:[#allocation2 + $0x154] ss:$8 sps:$4 sm:$0xff]   ;;  %v2257_v21 = vld [vmem:[#allocation2 + $0x50] ss:$8 sps:$4 sm:$0xff]   ;;  %v2265_v24 = vld [vmem:[#allocation2 + $0x44] ss:$8 sps:$4 sm:$0xff]  }
  0x30   :  { %940 = vmatprep.subr.bf16.mxu0 %v2247_v12  ;;  %1053 = vmatprep.subr.bf16.mxu1 %v2250_v14  ;;  %v2260_v22 = vld [vmem:[#allocation2 + $0x150] ss:$8 sps:$4 sm:$0xff]   ;;  %v2268_v25 = vld [vmem:[#allocation2 + $0x144] ss:$8 sps:$4 sm:$0xff]   ;;  %v2263_v26 = vld [vmem:[#allocation2 + $0x40] ss:$8 sps:$4 sm:$0xff]  }
  0x31   :  { %v2239_v23 = vld [vmem:[%s2809_s0 + $0x10] sm:$0xff]   ;;  %v2266_v27 = vld [vmem:[#allocation2 + $0x140] ss:$8 sps:$4 sm:$0xff]   ;;  %v2240_v32 = vld [vmem:[%s2809_s0 + $0x18] sm:$0xff]  }
  0x32   :  { %1879 = vmatmul.mubr.msk.bf16.vlgmr.msra.gmra.mxu0 %vm198_vm0, %v2237_v9  ;;  %1887 = vmatmul.mubr.msk.bf16.vlgmr.msra.gmra.mxu1 %vm198_vm0, %v2237_v9  ;;  %v2271_v28 = vld [vmem:[#allocation2 + $0x34] ss:$8 sps:$4 sm:$0xff]   ;;  %v2269_v30 = vld [vmem:[#allocation2 + $0x30] ss:$8 sps:$4 sm:$0xff]   ;;  %v2277_v33 = vld [vmem:[#allocation2 + $0x24] ss:$8 sps:$4 sm:$0xff]  }
  0x33   :  { %265 = vmatprep.mubr.bf16.mxu0 %v2464_v0  ;;  %378 = vmatprep.mubr.bf16.mxu1 %v2464_v0  ;;  %v2274_v29 = vld [vmem:[#allocation2 + $0x134] ss:$8 sps:$4 sm:$0xff]   ;;  %v2272_v31 = vld [vmem:[#allocation2 + $0x130] ss:$8 sps:$4 sm:$0xff]   ;;  %v2280_v34 = vld [vmem:[#allocation2 + $0x124] ss:$8 sps:$4 sm:$0xff]  }
  0x34   :  { %941 = vmatpush1.bf16.msra.mxu0 %v2245_v11  ;;  %1054 = vmatpush1.bf16.msra.mxu1 %v2248_v13  ;;  %v2275_v35 = vld [vmem:[#allocation2 + $0x20] ss:$8 sps:$4 sm:$0xff]   ;;  %v2283_v37 = vld [vmem:[#allocation2 + $0x14] ss:$8 sps:$4 sm:$0xff]   ;;  %v2281_v39 = vld [vmem:[#allocation2 + $0x10] ss:$8 sps:$4 sm:$0xff]  }
  0x35   :  { %942 = vmatprep.subr.bf16.mxu0 %v2253_v16  ;;  %1055 = vmatprep.subr.bf16.mxu1 %v2256_v18  ;;  %v2278_v36 = vld [vmem:[#allocation2 + $0x120] ss:$8 sps:$4 sm:$0xff]   ;;  %v2286_v38 = vld [vmem:[#allocation2 + $0x114] ss:$8 sps:$4 sm:$0xff]   ;;  %v2284_v40 = vld [vmem:[#allocation2 + $0x110] ss:$8 sps:$4 sm:$0xff]  }
  0x36   :  { %v2578_v41 = vld [vmem:[%s2809_s0 + $0x20] sm:$0xff]   ;;  %v2295_v46 = vld [vmem:[#allocation2 + $0xf4] ss:$8 sps:$4 sm:$0xff]   ;;  %v2293_v48 = vld [vmem:[#allocation2 + $0xf0] ss:$8 sps:$4 sm:$0xff]  }
  0x37   :  { %v2289_v42 = vld [vmem:[#allocation2 + $0x4] ss:$8 sps:$4 sm:$0xff]   ;;  %v2287_v44 = vld [vmem:[#allocation2] ss:$8 sps:$4 sm:$0xff]   ;;  %v2298_v47 = vld [vmem:[#allocation2 + $0x1f4] ss:$8 sps:$4 sm:$0xff]  }
  0x38   :  { %943 = vmatpush1.bf16.msra.mxu0 %v2251_v15  ;;  %1056 = vmatpush1.bf16.msra.mxu1 %v2254_v17  ;;  %v2292_v43 = vld [vmem:[#allocation2 + $0x104] ss:$8 sps:$4 sm:$0xff]   ;;  %v2290_v45 = vld [vmem:[#allocation2 + $0x100] ss:$8 sps:$4 sm:$0xff]   ;;  %v2296_v49 = vld [vmem:[#allocation2 + $0x1f0] ss:$8 sps:$4 sm:$0xff]  }
  0x39   :  { %944 = vmatprep.subr.bf16.mxu0 %v2259_v19  ;;  %1057 = vmatprep.subr.bf16.mxu1 %v2262_v20  ;;  %v2589_v50 = vld [vmem:[%s2809_s0 + $0x28] sm:$0xff]   ;;  %v2307_v55 = vld [vmem:[#allocation2 + $0xd4] ss:$8 sps:$4 sm:$0xff]   ;;  %v2305_v57 = vld [vmem:[#allocation2 + $0xd0] ss:$8 sps:$4 sm:$0xff]   ;;  %v98_v19 = vlaneseq }
  0x3a   :  { %1880 = vmatmul.mubr.msk.bf16.gmra.mxu0 %vm198_vm0, %v2238_v10  ;;  %1888 = vmatmul.mubr.msk.bf16.gmra.mxu1 %vm198_vm0, %v2238_v10  ;;  %v2301_v51 = vld [vmem:[#allocation2 + $0xe4] ss:$8 sps:$4 sm:$0xff]   ;;  %v2299_v52 = vld [vmem:[#allocation2 + $0xe0] ss:$8 sps:$4 sm:$0xff]   ;;  %v2310_v56 = vld [vmem:[#allocation2 + $0x1d4] ss:$8 sps:$4 sm:$0xff]  }
  0x3b   :  { %275 = vmatprep.mubr.bf16.mxu0 %v2464_v0  ;;  %388 = vmatprep.mubr.bf16.mxu1 %v2464_v0  ;;  %v2302_v53 = vld [vmem:[#allocation2 + $0x1e0] ss:$8 sps:$4 sm:$0xff]   ;;  %v2304_v54 = vld [vmem:[#allocation2 + $0x1e4] ss:$8 sps:$4 sm:$0xff]   ;;  %v2308_v58 = vld [vmem:[#allocation2 + $0x1d0] ss:$8 sps:$4 sm:$0xff]  }
  0x3c   :  { %945 = vmatpush1.bf16.msra.mxu0 %v2257_v21  ;;  %1058 = vmatpush1.bf16.msra.mxu1 %v2260_v22  ;;  %v2600_v59 = vld [vmem:[%s2809_s0 + $0x30] sm:$0xff]   ;;  %v2313_v60 = vld [vmem:[#allocation2 + $0xc4] ss:$8 sps:$4 sm:$0xff]   ;;  %v2311_v62 = vld [vmem:[#allocation2 + $0xc0] ss:$8 sps:$4 sm:$0xff]   ;;  %v2623_v20 = vshrl.u32 %v98_v19, 7 }
  0x3d   :  { %946 = vmatprep.subr.bf16.mxu0 %v2265_v24  ;;  %1059 = vmatprep.subr.bf16.mxu1 %v2268_v25  ;;  %v2316_v61 = vld [vmem:[#allocation2 + $0x1c4] ss:$8 sps:$4 sm:$0xff]   ;;  %v2314_v63 = vld [vmem:[#allocation2 + $0x1c0] ss:$8 sps:$4 sm:$0xff]   ;;  %v2319_v1 = vld [vmem:[#allocation2 + $0xb4] ss:$8 sps:$4 sm:$0xff]  }
  0x3e   :  { %v2322_v2 = vld [vmem:[#allocation2 + $0x1b4] ss:$8 sps:$4 sm:$0xff]   ;;  %v2317_v3 = vld [vmem:[#allocation2 + $0xb0] ss:$8 sps:$4 sm:$0xff]   ;;  %v2328_v6 = vld [vmem:[#allocation2 + $0x1a4] ss:$8 sps:$4 sm:$0xff]  }
  0x3f   :  { %v2320_v4 = vld [vmem:[#allocation2 + $0x1b0] ss:$8 sps:$4 sm:$0xff]   ;;  %v2323_v7 = vld [vmem:[#allocation2 + $0xa0] ss:$8 sps:$4 sm:$0xff]   ;;  %v2331_v9 = vld [vmem:[#allocation2 + $0x94] ss:$8 sps:$4 sm:$0xff]  }
  0x40   :  { %947 = vmatpush1.bf16.msra.mxu0 %v2263_v26  ;;  %1060 = vmatpush1.bf16.msra.mxu1 %v2266_v27  ;;  %v2611_v5 = vld [vmem:[%s2809_s0 + $0x38] sm:$0xff]   ;;  %v2326_v8 = vld [vmem:[#allocation2 + $0x1a0] ss:$8 sps:$4 sm:$0xff]   ;;  %v2337_v13 = vld [vmem:[#allocation2 + $0x84] ss:$8 sps:$4 sm:$0xff]   ;;  %v104_v21 = vsub.s32 1, %v2623_v20 }
  0x41   :  { %948 = vmatprep.subr.bf16.mxu0 %v2271_v28  ;;  %1061 = vmatprep.subr.bf16.mxu1 %v2274_v29  ;;  %v2334_v10 = vld [vmem:[#allocation2 + $0x194] ss:$8 sps:$4 sm:$0xff]   ;;  %v2329_v11 = vld [vmem:[#allocation2 + $0x90] ss:$8 sps:$4 sm:$0xff]   ;;  %v2340_v14 = vld [vmem:[#allocation2 + $0x184] ss:$8 sps:$4 sm:$0xff]  }
  0x42   :  { %1881 = vmatmul.mubr.msk.bf16.gmra.mxu0 %vm198_vm0, %v2239_v23  ;;  %1889 = vmatmul.mubr.msk.bf16.gmra.mxu1 %vm198_vm0, %v2239_v23  ;;  %v2332_v12 = vld [vmem:[#allocation2 + $0x190] ss:$8 sps:$4 sm:$0xff]   ;;  %v2335_v15 = vld [vmem:[#allocation2 + $0x80] ss:$8 sps:$4 sm:$0xff]   ;;  %v112_v22 = vsub.s32 3, %v2623_v20  ;;  %v100_v23 = vsub.s32 0, %v2623_v20 }
  0x43   :  { %285 = vmatprep.mubr.bf16.mxu0 %v2464_v0  ;;  %398 = vmatprep.mubr.bf16.mxu1 %v2464_v0  ;;  %v2338_v16 = vld [vmem:[#allocation2 + $0x180] ss:$8 sps:$4 sm:$0xff]   ;;  %v2341_v17 = vld [vmem:[#allocation5 + $0x78] sm:$0xff]   ;;  %v108_v24 = vsub.s32 2, %v2623_v20 }
  0x44   :  { %949 = vmatpush1.bf16.msra.mxu0 %v2269_v30  ;;  %1062 = vmatpush1.bf16.msra.mxu1 %v2272_v31  ;;  %v2620_v18 = vld [vmem:[%s2813_s4 + $0x8] sm:$0xff]   ;;  %v85_v25 = vld [vmem:[%s2815_s6] sm:$0xf] }
  0x45   :  { %950 = vmatprep.subr.bf16.mxu0 %v2277_v33  ;;  %1063 = vmatprep.subr.bf16.mxu1 %v2280_v34  ;;  %v2634_v28 = vrot.slane %v85_v25, %v104_v21  ;;  %v2636_v29 = vrot.slane %v85_v25, %v112_v22  ;;  %v2640_v30 = vrot.slane %v85_v25, %v100_v23 }
  0x46   :  { %v2642_v31 = vrot.slane %v85_v25, %v108_v24  ;;  %v2345_v25 = vld [vmem:[#allocation5 + $0x68] sm:$0xff]  }
  0x48   :  { %951 = vmatpush1.bf16.msra.mxu0 %v2275_v35  ;;  %1064 = vmatpush1.bf16.msra.mxu1 %v2278_v36 }
  0x49   :  { %952 = vmatprep.subr.bf16.mxu0 %v2283_v37  ;;  %1065 = vmatprep.subr.bf16.mxu1 %v2286_v38 }
  0x4a   :  { %1882 = vmatmul.mubr.msk.bf16.gmra.mxu0 %vm198_vm0, %v2240_v32  ;;  %1890 = vmatmul.mubr.msk.bf16.gmra.mxu1 %vm198_vm0, %v2240_v32 }
  0x4b   :  { %295 = vmatprep.mubr.bf16.mxu0 %v2464_v0  ;;  %408 = vmatprep.mubr.bf16.mxu1 %v2464_v0 }
  0x4c   :  { %953 = vmatpush1.bf16.msra.mxu0 %v2281_v39  ;;  %1066 = vmatpush1.bf16.msra.mxu1 %v2284_v40 }
  0x4d   :  { %954 = vmatprep.subr.bf16.mxu0 %v2289_v42  ;;  %1067 = vmatprep.subr.bf16.mxu1 %v2292_v43 }
  0x50   :  { %955 = vmatpush1.bf16.msra.mxu0 %v2287_v44  ;;  %1068 = vmatpush1.bf16.msra.mxu1 %v2290_v45 }
  0x51   :  { %956 = vmatprep.subr.bf16.mxu0 %v2295_v46  ;;  %1069 = vmatprep.subr.bf16.mxu1 %v2298_v47 }
  0x52   :  { %1883 = vmatmul.mubr.msk.bf16.gmra.mxu0 %vm198_vm0, %v2578_v41  ;;  %1891 = vmatmul.mubr.msk.bf16.gmra.mxu1 %vm198_vm0, %v2578_v41 }
  0x53   :  { %305 = vmatprep.mubr.bf16.mxu0 %v2464_v0  ;;  %418 = vmatprep.mubr.bf16.mxu1 %v2464_v0 }
  0x54   :  { %957 = vmatpush2.bf16.msra.mxu0 %v2293_v48  ;;  %1070 = vmatpush2.bf16.msra.mxu1 %v2296_v49 }
  0x55   :  { %958 = vmatprep.subr.bf16.mxu0 %v2301_v51  ;;  %1071 = vmatprep.subr.bf16.mxu1 %v2304_v54 }
  0x58   :  { %959 = vmatpush2.bf16.msra.mxu0 %v2299_v52  ;;  %1072 = vmatpush2.bf16.msra.mxu1 %v2302_v53 }
  0x59   :  { %960 = vmatprep.subr.bf16.mxu0 %v2307_v55  ;;  %1073 = vmatprep.subr.bf16.mxu1 %v2310_v56 }
  0x5a   :  { %1884 = vmatmul.mubr.msk.bf16.gmra.mxu0 %vm198_vm0, %v2589_v50  ;;  %1892 = vmatmul.mubr.msk.bf16.gmra.mxu1 %vm198_vm0, %v2589_v50 }
  0x5b   :  { %315 = vmatprep.mubr.bf16.mxu0 %v2464_v0  ;;  %428 = vmatprep.mubr.bf16.mxu1 %v2464_v0 }
  0x5c   :  { %961 = vmatpush2.bf16.msra.mxu0 %v2305_v57  ;;  %1074 = vmatpush2.bf16.msra.mxu1 %v2308_v58 }
  0x5d   :  { %962 = vmatprep.subr.bf16.mxu0 %v2313_v60  ;;  %1075 = vmatprep.subr.bf16.mxu1 %v2316_v61 }
  0x60   :  { %963 = vmatpush2.bf16.msra.mxu0 %v2311_v62  ;;  %1076 = vmatpush2.bf16.msra.mxu1 %v2314_v63  ;;  %v2342_v63 = vld [vmem:[#allocation5 + $0x38] sm:$0xff]  }
  0x61   :  { %964 = vmatprep.subr.bf16.mxu0 %v2319_v1  ;;  %1077 = vmatprep.subr.bf16.mxu1 %v2322_v2 }
  0x62   :  { %1885 = vmatmul.mubr.msk.bf16.gmra.mxu0 %vm198_vm0, %v2600_v59  ;;  %1893 = vmatmul.mubr.msk.bf16.gmra.mxu1 %vm198_vm0, %v2600_v59 }
  0x63   :  { %325 = vmatprep.mubr.bf16.mxu0 %v2464_v0  ;;  %438 = vmatprep.mubr.bf16.mxu1 %v2464_v0  ;;  %v2325_v0 = vld [vmem:[#allocation2 + $0xa4] ss:$8 sps:$4 sm:$0xff]  }
  0x64   :  { %965 = vmatpush2.bf16.msra.mxu0 %v2317_v3  ;;  %1078 = vmatpush2.bf16.msra.mxu1 %v2320_v4 }
  0x65   :  { %966 = vmatprep.subr.bf16.mxu0 %v2325_v0  ;;  %1079 = vmatprep.subr.bf16.mxu1 %v2328_v6  ;;  %v2343_v6 = vld [vmem:[#allocation5 + $0x70] sm:$0xff]  }
  0x68   :  { %967 = vmatpush2.bf16.msra.mxu0 %v2323_v7  ;;  %1080 = vmatpush2.bf16.msra.mxu1 %v2326_v8 }
  0x69   :  { %968 = vmatprep.subr.bf16.mxu0 %v2331_v9  ;;  %1081 = vmatprep.subr.bf16.mxu1 %v2334_v10 }
  0x6a   :  { %1886 = vmatmul.mubr.msk.bf16.gmra.mxu0 %vm198_vm0, %v2611_v5  ;;  %1894 = vmatmul.mubr.msk.bf16.gmra.mxu1 %vm198_vm0, %v2611_v5 }
  0x6c   :  { %969 = vmatpush2.bf16.msra.mxu0 %v2329_v11  ;;  %1082 = vmatpush2.bf16.msra.mxu1 %v2332_v12 }
  0x6d   :  { %970 = vmatprep.subr.bf16.mxu0 %v2337_v13  ;;  %1083 = vmatprep.subr.bf16.mxu1 %v2340_v14 }
  0x70   :  { %971 = vmatpush2.bf16.msra.mxu0 %v2335_v15  ;;  %1084 = vmatpush2.bf16.msra.mxu1 %v2338_v16  ;;  %v2344_v16 = vld [vmem:[#allocation5 + $0x30] sm:$0xff]  }
  0x71   :  { %2084 = vmatprep.subr.bf16.mxu1 %v2341_v17  ;;  %2164 = vmatprep.subr.bf16.mxu0 %v2620_v18 }
  0xf2   :  { %v257_v26 = vpop.f32.mrf.mxu0  ;;  %v370_v27 = vpop.f32.mrf.mxu1 }
  0xf3   :  { %v258_v40 = vadd.f32 %v257_v26, %v2640_v30  ;;  %v371_v42 = vadd.f32 %v370_v27, %v2642_v31 }
  0xf4   :  { %v259_v32 = vpop.f32.mrf.mxu0  ;;  %v372_v33 = vpop.f32.mrf.mxu1 }
  0xf5   :  { %v260_v36 = vadd.f32 %v259_v32, %v2634_v28  ;;  %v373_v37 = vadd.f32 %v372_v33, %v2636_v29  ;;  %v449_v56 = vmax.f32 %v258_v40, 0.0  ;;  %v451_v57 = vmax.f32 %v371_v42, 0.0  ;;  %v2346_v40 = vld [vmem:[#allocation5 + $0x28] sm:$0xff]  }
  0xf6   :  { %v261_v34 = vpop.f32.mrf.mxu0  ;;  %v374_v35 = vpop.f32.mrf.mxu1 }
  0xf7   :  { %v262_v38 = vadd.f32 %v261_v34, %v2640_v30  ;;  %v375_v39 = vadd.f32 %v374_v35, %v2642_v31  ;;  %v450_v52 = vmax.f32 %v260_v36, 0.0  ;;  %v452_v53 = vmax.f32 %v373_v37, 0.0 }
  0xf8   :  { %v263_v43 = vpop.f32.mrf.mxu0  ;;  %v376_v44 = vpop.f32.mrf.mxu1 }
  0xf9   :  { %v264_v45 = vadd.f32 %v263_v43, %v2634_v28  ;;  %v377_v46 = vadd.f32 %v376_v44, %v2636_v29  ;;  %v453_v47 = vmax.f32 %v262_v38, 0.0  ;;  %v455_v48 = vmax.f32 %v375_v39, 0.0 }
  0xfa   :  { %v267_v49 = vpop.f32.mrf.mxu0  ;;  %v380_v51 = vpop.f32.mrf.mxu1 }
  0xfb   :  { %v454_v54 = vmax.f32 %v264_v45, 0.0  ;;  %v456_v55 = vmax.f32 %v377_v46, 0.0  ;;  %v513_v1 = vpack.c.bf16 %v453_v47, %v449_v56  ;;  %v515_v2 = vpack.c.bf16 %v455_v48, %v451_v57  ;;  %v2347_v46 = vld [vmem:[#allocation5 + $0x60] sm:$0xff]  }
  0xfc   :  { %v269_v58 = vpop.f32.mrf.mxu0  ;;  %v382_v60 = vpop.f32.mrf.mxu1  ;;  %v268_v10 = vadd.f32 %v267_v49, %v2640_v30  ;;  %v381_v11 = vadd.f32 %v380_v51, %v2642_v31  ;;  %v2348_v57 = vld [vmem:[#allocation5 + $0x20] sm:$0xff]  }
  0xfd   :  { %v514_v61 = vpack.c.bf16 %v454_v54, %v450_v52  ;;  %v516_v62 = vpack.c.bf16 %v456_v55, %v452_v53  ;;  %v270_v3 = vadd.f32 %v269_v58, %v2634_v28  ;;  %v383_v7 = vadd.f32 %v382_v60, %v2636_v29 }
  0xfe   :  { %v271_v4 = vpop.f32.mrf.mxu0  ;;  %v384_v0 = vpop.f32.mrf.mxu1  ;;  %v457_v34 = vmax.f32 %v268_v10, 0.0  ;;  %v459_v35 = vmax.f32 %v381_v11, 0.0  ;;  %v2351_v11 = vld [vmem:[#allocation5 + $0x18] sm:$0xff]  }
  0xff   :  { %v272_v8 = vadd.f32 %v271_v4, %v2640_v30  ;;  %v385_v9 = vadd.f32 %v384_v0, %v2642_v31  ;;  %972 = vmatprep.mubr.bf16.mxu0 %v514_v61  ;;  %1085 = vmatprep.mubr.bf16.mxu1 %v516_v62  ;;  %v458_v26 = vmax.f32 %v270_v3, 0.0  ;;  %v460_v27 = vmax.f32 %v383_v7, 0.0 }
 0x100   :  { %v273_v12 = vpop.f32.mrf.mxu0  ;;  %v386_v13 = vpop.f32.mrf.mxu1  ;;  %973 = vmatmul.mubr.bf16.vlgmr.msra.gmra.mxu0 %v513_v1  ;;  %1086 = vmatmul.mubr.bf16.vlgmr.msra.gmra.mxu1 %v515_v2 }
 0x101   :  { %v274_v14 = vadd.f32 %v273_v12, %v2634_v28  ;;  %v387_v15 = vadd.f32 %v386_v13, %v2636_v29  ;;  %2085 = vmatpush3.bf16.msra.mxu1 %v2342_v63  ;;  %2165 = vmatpush3.bf16.msra.mxu0 %v2620_v18  ;;  %v461_v17 = vmax.f32 %v272_v8, 0.0  ;;  %v463_v19 = vmax.f32 %v385_v9, 0.0  ;;  %v2349_v63 = vld [vmem:[#allocation5 + $0x58] sm:$0xff]  }
 0x102   :  { %v277_v22 = vpop.f32.mrf.mxu0  ;;  %v390_v24 = vpop.f32.mrf.mxu1  ;;  %2086 = vmatprep.subr.bf16.mxu1 %v2343_v6 }
 0x103   :  { %v462_v32 = vmax.f32 %v274_v14, 0.0  ;;  %v464_v33 = vmax.f32 %v387_v15, 0.0  ;;  %v517_v42 = vpack.c.bf16 %v461_v17, %v457_v34  ;;  %v519_v18 = vpack.c.bf16 %v463_v19, %v459_v35  ;;  %v2352_v17 = vld [vmem:[#allocation5 + $0x50] sm:$0xff]  }
 0x104   :  { %v279_v36 = vpop.f32.mrf.mxu0  ;;  %v392_v37 = vpop.f32.mrf.mxu1  ;;  %v278_v51 = vadd.f32 %v277_v22, %v2640_v30  ;;  %v391_v52 = vadd.f32 %v390_v24, %v2642_v31  ;;  %v2353_v35 = vld [vmem:[#allocation5 + $0x10] sm:$0xff]  }
 0x105   :  { %v518_v38 = vpack.c.bf16 %v462_v32, %v458_v26  ;;  %v520_v39 = vpack.c.bf16 %v464_v33, %v460_v27  ;;  %2087 = vmatpush3.bf16.msra.mxu1 %v2344_v16  ;;  %v280_v43 = vadd.f32 %v279_v36, %v2634_v28  ;;  %v393_v47 = vadd.f32 %v392_v37, %v2636_v29 }
 0x106   :  { %v281_v44 = vpop.f32.mrf.mxu0  ;;  %v394_v45 = vpop.f32.mrf.mxu1  ;;  %2088 = vmatprep.subr.bf16.mxu1 %v2345_v25  ;;  %v465_v0 = vmax.f32 %v278_v51, 0.0  ;;  %v467_v6 = vmax.f32 %v391_v52, 0.0 }
 0x107   :  { %v282_v48 = vadd.f32 %v281_v44, %v2640_v30  ;;  %v395_v49 = vadd.f32 %v394_v45, %v2642_v31  ;;  %982 = vmatprep.mubr.bf16.mxu0 %v518_v38  ;;  %1095 = vmatprep.mubr.bf16.mxu1 %v520_v39  ;;  %v466_v1 = vmax.f32 %v280_v43, 0.0  ;;  %v468_v2 = vmax.f32 %v393_v47, 0.0 }
 0x108   :  { %v283_v53 = vpop.f32.mrf.mxu0  ;;  %v396_v54 = vpop.f32.mrf.mxu1  ;;  %983 = vmatmul.mubr.bf16.gmra.mxu0 %v517_v42  ;;  %1096 = vmatmul.mubr.bf16.gmra.mxu1 %v519_v18 }
 0x109   :  { %v284_v55 = vadd.f32 %v283_v53, %v2634_v28  ;;  %v397_v56 = vadd.f32 %v396_v54, %v2636_v29  ;;  %2089 = vmatpush3.bf16.msra.mxu1 %v2346_v40  ;;  %v469_v58 = vmax.f32 %v282_v48, 0.0  ;;  %v471_v60 = vmax.f32 %v395_v49, 0.0  ;;  %v2354_v40 = vld [vmem:[#allocation5 + $0x48] sm:$0xff]  }
 0x10a   :  { %v287_v61 = vpop.f32.mrf.mxu0  ;;  %v400_v62 = vpop.f32.mrf.mxu1  ;;  %2090 = vmatprep.subr.bf16.mxu1 %v2347_v46 }
 0x10b   :  { %v470_v3 = vmax.f32 %v284_v55, 0.0  ;;  %v472_v4 = vmax.f32 %v397_v56, 0.0  ;;  %v521_v12 = vpack.c.bf16 %v469_v58, %v465_v0  ;;  %v523_v13 = vpack.c.bf16 %v471_v60, %v467_v6 }
 0x10c   :  { %v289_v7 = vpop.f32.mrf.mxu0  ;;  %v402_v8 = vpop.f32.mrf.mxu1  ;;  %v288_v25 = vadd.f32 %v287_v61, %v2640_v30  ;;  %v401_v26 = vadd.f32 %v400_v62, %v2642_v31 }
 0x10d   :  { %v522_v9 = vpack.c.bf16 %v470_v3, %v466_v1  ;;  %v524_v10 = vpack.c.bf16 %v472_v4, %v468_v2  ;;  %2091 = vmatpush3.bf16.msra.mxu1 %v2348_v57  ;;  %v290_v14 = vadd.f32 %v289_v7, %v2634_v28  ;;  %v403_v19 = vadd.f32 %v402_v8, %v2636_v29 }
 0x10e   :  { %v291_v15 = vpop.f32.mrf.mxu0  ;;  %v404_v16 = vpop.f32.mrf.mxu1  ;;  %2092 = vmatprep.subr.bf16.mxu1 %v2349_v63  ;;  %v473_v45 = vmax.f32 %v288_v25, 0.0  ;;  %v475_v46 = vmax.f32 %v401_v26, 0.0 }
 0x10f   :  { %v292_v22 = vadd.f32 %v291_v15, %v2640_v30  ;;  %v405_v24 = vadd.f32 %v404_v16, %v2642_v31  ;;  %992 = vmatprep.mubr.bf16.mxu0 %v522_v9  ;;  %1105 = vmatprep.mubr.bf16.mxu1 %v524_v10  ;;  %v474_v42 = vmax.f32 %v290_v14, 0.0  ;;  %v476_v18 = vmax.f32 %v403_v19, 0.0 }
 0x110   :  { %v293_v27 = vpop.f32.mrf.mxu0  ;;  %v406_v32 = vpop.f32.mrf.mxu1  ;;  %993 = vmatmul.mubr.bf16.gmra.mxu0 %v521_v12  ;;  %1106 = vmatmul.mubr.bf16.gmra.mxu1 %v523_v13 }
 0x111   :  { %v294_v33 = vadd.f32 %v293_v27, %v2634_v28  ;;  %v407_v34 = vadd.f32 %v406_v32, %v2636_v29  ;;  %2093 = vmatpush3.bf16.msra.mxu1 %v2351_v11  ;;  %v477_v36 = vmax.f32 %v292_v22, 0.0  ;;  %v479_v37 = vmax.f32 %v405_v24, 0.0 }
 0x112   :  { %v297_v38 = vpop.f32.mrf.mxu0  ;;  %v410_v39 = vpop.f32.mrf.mxu1  ;;  %2094 = vmatprep.subr.bf16.mxu1 %v2352_v17 }
 0x113   :  { %v478_v43 = vmax.f32 %v294_v33, 0.0  ;;  %v480_v44 = vmax.f32 %v407_v34, 0.0  ;;  %v525_v52 = vpack.c.bf16 %v477_v36, %v473_v45  ;;  %v527_v53 = vpack.c.bf16 %v479_v37, %v475_v46 }
 0x114   :  { %v299_v47 = vpop.f32.mrf.mxu0  ;;  %v412_v48 = vpop.f32.mrf.mxu1  ;;  %v298_v61 = vadd.f32 %v297_v38, %v2640_v30  ;;  %v411_v62 = vadd.f32 %v410_v39, %v2642_v31 }
 0x115   :  { %v526_v49 = vpack.c.bf16 %v478_v43, %v474_v42  ;;  %v528_v51 = vpack.c.bf16 %v480_v44, %v476_v18  ;;  %2095 = vmatpush3.bf16.msra.mxu1 %v2353_v35  ;;  %v300_v54 = vadd.f32 %v299_v47, %v2634_v28  ;;  %v413_v57 = vadd.f32 %v412_v48, %v2636_v29 }
 0x116   :  { %v301_v55 = vpop.f32.mrf.mxu0  ;;  %v414_v56 = vpop.f32.mrf.mxu1  ;;  %2096 = vmatprep.subr.bf16.mxu1 %v2354_v40  ;;  %v481_v12 = vmax.f32 %v298_v61, 0.0  ;;  %v483_v13 = vmax.f32 %v411_v62, 0.0 }
 0x117   :  { %v302_v58 = vadd.f32 %v301_v55, %v2640_v30  ;;  %v415_v60 = vadd.f32 %v414_v56, %v2642_v31  ;;  %1002 = vmatprep.mubr.bf16.mxu0 %v526_v49  ;;  %1115 = vmatprep.mubr.bf16.mxu1 %v528_v51  ;;  %v482_v8 = vmax.f32 %v300_v54, 0.0  ;;  %v484_v9 = vmax.f32 %v413_v57, 0.0 }
 0x118   :  { %v303_v63 = vpop.f32.mrf.mxu0  ;;  %v416_v1 = vpop.f32.mrf.mxu1  ;;  %1003 = vmatmul.mubr.bf16.gmra.mxu0 %v525_v52  ;;  %1116 = vmatmul.mubr.bf16.gmra.mxu1 %v527_v53 }
 0x119   :  { %v304_v2 = vadd.f32 %v303_v63, %v2634_v28  ;;  %v417_v3 = vadd.f32 %v416_v1, %v2636_v29  ;;  %v485_v4 = vmax.f32 %v302_v58, 0.0  ;;  %v487_v0 = vmax.f32 %v415_v60, 0.0 }
 0x11a   :  { %v307_v6 = vpop.f32.mrf.mxu0  ;;  %v420_v7 = vpop.f32.mrf.mxu1 }
 0x11b   :  { %v486_v10 = vmax.f32 %v304_v2, 0.0  ;;  %v488_v11 = vmax.f32 %v417_v3, 0.0  ;;  %v529_v19 = vpack.c.bf16 %v485_v4, %v481_v12  ;;  %v531_v22 = vpack.c.bf16 %v487_v0, %v483_v13 }
 0x11c   :  { %v309_v14 = vpop.f32.mrf.mxu0  ;;  %v422_v15 = vpop.f32.mrf.mxu1  ;;  %v308_v34 = vadd.f32 %v307_v6, %v2640_v30  ;;  %v421_v35 = vadd.f32 %v420_v7, %v2642_v31 }
 0x11d   :  { %v530_v16 = vpack.c.bf16 %v486_v10, %v482_v8  ;;  %v532_v17 = vpack.c.bf16 %v488_v11, %v484_v9  ;;  %v310_v24 = vadd.f32 %v309_v14, %v2634_v28  ;;  %v423_v27 = vadd.f32 %v422_v15, %v2636_v29 }
 0x11e   :  { %v311_v25 = vpop.f32.mrf.mxu0  ;;  %v424_v26 = vpop.f32.mrf.mxu1  ;;  %v489_v48 = vmax.f32 %v308_v34, 0.0  ;;  %v491_v49 = vmax.f32 %v421_v35, 0.0 }
 0x11f   :  { %v312_v32 = vadd.f32 %v311_v25, %v2640_v30  ;;  %v425_v33 = vadd.f32 %v424_v26, %v2642_v31  ;;  %1012 = vmatprep.mubr.bf16.mxu0 %v530_v16  ;;  %1125 = vmatprep.mubr.bf16.mxu1 %v532_v17  ;;  %v490_v44 = vmax.f32 %v310_v24, 0.0  ;;  %v492_v45 = vmax.f32 %v423_v27, 0.0 }
 0x120   :  { %v313_v36 = vpop.f32.mrf.mxu0  ;;  %v426_v37 = vpop.f32.mrf.mxu1  ;;  %1013 = vmatmul.mubr.bf16.gmra.mxu0 %v529_v19  ;;  %1126 = vmatmul.mubr.bf16.gmra.mxu1 %v531_v22 }
 0x121   :  { %v314_v38 = vadd.f32 %v313_v36, %v2634_v28  ;;  %v427_v39 = vadd.f32 %v426_v37, %v2636_v29  ;;  %v493_v40 = vmax.f32 %v312_v32, 0.0  ;;  %v495_v42 = vmax.f32 %v425_v33, 0.0 }
 0x122   :  { %v317_v18 = vpop.f32.mrf.mxu0  ;;  %v430_v43 = vpop.f32.mrf.mxu1 }
 0x123   :  { %v494_v46 = vmax.f32 %v314_v38, 0.0  ;;  %v496_v47 = vmax.f32 %v427_v39, 0.0  ;;  %v533_v55 = vpack.c.bf16 %v493_v40, %v489_v48  ;;  %v535_v56 = vpack.c.bf16 %v495_v42, %v491_v49 }
 0x124   :  { %v319_v51 = vpop.f32.mrf.mxu0  ;;  %v432_v52 = vpop.f32.mrf.mxu1  ;;  %v318_v1 = vadd.f32 %v317_v18, %v2640_v30  ;;  %v431_v2 = vadd.f32 %v430_v43, %v2642_v31 }
 0x125   :  { %v534_v53 = vpack.c.bf16 %v494_v46, %v490_v44  ;;  %v536_v54 = vpack.c.bf16 %v496_v47, %v492_v45  ;;  %v320_v57 = vadd.f32 %v319_v51, %v2634_v28  ;;  %v433_v61 = vadd.f32 %v432_v52, %v2636_v29 }
 0x126   :  { %v321_v58 = vpop.f32.mrf.mxu0  ;;  %v434_v60 = vpop.f32.mrf.mxu1  ;;  %v497_v15 = vmax.f32 %v318_v1, 0.0  ;;  %v499_v16 = vmax.f32 %v431_v2, 0.0 }
 0x127   :  { %v322_v62 = vadd.f32 %v321_v58, %v2640_v30  ;;  %v435_v63 = vadd.f32 %v434_v60, %v2642_v31  ;;  %1022 = vmatprep.mubr.bf16.mxu0 %v534_v53  ;;  %1135 = vmatprep.mubr.bf16.mxu1 %v536_v54  ;;  %v498_v11 = vmax.f32 %v320_v57, 0.0  ;;  %v500_v12 = vmax.f32 %v433_v61, 0.0  ;;  %v2356_v54 = vld [vmem:[#allocation5 + $0x40] sm:$0xff]   ;;  %v2368_v57 = vld [vmem:[%s2809_s0 + $0x8] sm:$0xff]   ;;  %v2369_v58 = vld [vmem:[%s2809_s0 + $0x10] sm:$0xff]  }
 0x128   :  { %v323_v3 = vpop.f32.mrf.mxu0  ;;  %v436_v4 = vpop.f32.mrf.mxu1  ;;  %1023 = vmatmul.mubr.bf16.gmra.mxu0 %v533_v55  ;;  %1136 = vmatmul.mubr.bf16.gmra.mxu1 %v535_v56  ;;  %v2357_v55 = vld [vmem:[#allocation5] sm:$0xff]   ;;  %v2370_v60 = vld [vmem:[%s2809_s0 + $0x18] sm:$0xff]  }
 0x129   :  { %v324_v0 = vadd.f32 %v323_v3, %v2634_v28  ;;  %v437_v6 = vadd.f32 %v436_v4, %v2636_v29  ;;  %v501_v7 = vmax.f32 %v322_v62, 0.0  ;;  %v503_v8 = vmax.f32 %v435_v63, 0.0  ;;  %v2358_v56 = vld [vmem:[%s2813_s4] sm:$0xff]   ;;  %v2359_v61 = vld [vmem:[#allocation7 + $0x38] sm:$0xff]   ;;  %v2360_v62 = vld [vmem:[#allocation7 + $0x30] sm:$0xff]  }
 0x12a   :  { %v327_v9 = vpop.f32.mrf.mxu0  ;;  %v440_v10 = vpop.f32.mrf.mxu1  ;;  %2166 = vmatprep.subr.bf16.mxu0 %v2358_v56  ;;  %v86_v63 = vld [vmem:[%s2815_s6 + $0x4] sm:$0x3] }
 0x12b   :  { %v502_v13 = vmax.f32 %v324_v0, 0.0  ;;  %v504_v14 = vmax.f32 %v437_v6, 0.0  ;;  %v537_v25 = vpack.c.bf16 %v501_v7, %v497_v15  ;;  %v539_v26 = vpack.c.bf16 %v503_v8, %v499_v16  ;;  %2167 = vmatpush3.bf16.msra.mxu0 %v2358_v56 }
 0x12c   :  { %v329_v17 = vpop.f32.mrf.mxu0  ;;  %v442_v19 = vpop.f32.mrf.mxu1  ;;  %v328_v37 = vadd.f32 %v327_v9, %v2640_v30  ;;  %v441_v38 = vadd.f32 %v440_v10, %v2642_v31  ;;  %2184 = vmatprep.subr.bf16.mxu0 %v2359_v61 }
 0x12d   :  { %v538_v22 = vpack.c.bf16 %v502_v13, %v498_v11  ;;  %v540_v24 = vpack.c.bf16 %v504_v14, %v500_v12  ;;  %v330_v27 = vadd.f32 %v329_v17, %v2634_v28  ;;  %v443_v34 = vadd.f32 %v442_v19, %v2636_v29 }
 0x12e   :  { %v331_v32 = vpop.f32.mrf.mxu0  ;;  %v444_v33 = vpop.f32.mrf.mxu1  ;;  %v505_v49 = vmax.f32 %v328_v37, 0.0  ;;  %v507_v51 = vmax.f32 %v441_v38, 0.0 }
 0x12f   :  { %v332_v35 = vadd.f32 %v331_v32, %v2640_v30  ;;  %v445_v36 = vadd.f32 %v444_v33, %v2642_v31  ;;  %1032 = vmatprep.mubr.bf16.mxu0 %v538_v22  ;;  %1145 = vmatprep.mubr.bf16.mxu1 %v540_v24  ;;  %v506_v45 = vmax.f32 %v330_v27, 0.0  ;;  %v508_v46 = vmax.f32 %v443_v34, 0.0 }
 0x130   :  { %v333_v39 = vpop.f32.mrf.mxu0  ;;  %v446_v40 = vpop.f32.mrf.mxu1  ;;  %1033 = vmatmul.mubr.bf16.gmra.mxu0 %v537_v25  ;;  %1146 = vmatmul.mubr.bf16.gmra.mxu1 %v539_v26 }
 0x131   :  { %v334_v42 = vadd.f32 %v333_v39, %v2634_v28  ;;  %v447_v18 = vadd.f32 %v446_v40, %v2636_v29  ;;  %v509_v43 = vmax.f32 %v332_v35, 0.0  ;;  %v511_v44 = vmax.f32 %v445_v36, 0.0  ;;  %v2367_v28 = vld [vmem:[%s2809_s0] sm:$0xff]   ;;  %v2355_v29 = vld [vmem:[#allocation5 + $0x8] sm:$0xff]  }
 0x132   :  { %2097 = vmatpush3.bf16.msra.mxu1 %v2355_v29 }
 0x133   :  { %v510_v47 = vmax.f32 %v334_v42, 0.0  ;;  %v512_v48 = vmax.f32 %v447_v18, 0.0  ;;  %v541_v53 = vpack.c.bf16 %v509_v43, %v505_v49  ;;  %v543_v31 = vpack.c.bf16 %v511_v44, %v507_v51  ;;  %2098 = vmatprep.subr.bf16.mxu1 %v2356_v54 }
 0x135   :  { %v542_v52 = vpack.c.bf16 %v510_v47, %v506_v45  ;;  %v544_v30 = vpack.c.bf16 %v512_v48, %v508_v46 }
 0x136   :  { %2099 = vmatpush3.bf16.msra.mxu1 %v2357_v55 }
 0x137   :  { %1042 = vmatprep.mubr.bf16.mxu0 %v542_v52  ;;  %1155 = vmatprep.mubr.bf16.mxu1 %v544_v30 }
 0x138   :  { %1043 = vmatmul.mubr.bf16.gmra.mxu0 %v541_v53  ;;  %1156 = vmatmul.mubr.bf16.gmra.mxu1 %v543_v31 }
 0x139   :  { %2168 = vmatprep.mubr.msk.bf16.mxu0 %vm198_vm0, %v2367_v28 }
 0x140   :  { %2169 = vmatmul.mubr.msk.bf16.vlgmr.msra.gmra.mxu0 %vm198_vm0, %v2368_v57 }
 0x141   :  { %2172 = vmatprep.mubr.msk.bf16.mxu0 %vm198_vm0, %v2369_v58  ;;  %2185 = vmatpush3.bf16.msra.mxu0 %v2359_v61 }
 0x142   :  { %2186 = vmatprep.subr.bf16.mxu0 %v2360_v62 }
 0x145   :  { %2187 = vmatpush3.bf16.msra.mxu0 %v2360_v62 }
 0x148   :  { %2173 = vmatmul.mubr.msk.bf16.gmra.mxu0 %vm198_vm0, %v2370_v60 }
 0x149   :  { %2176 = vmatprep.mubr.msk.bf16.mxu0 %vm198_vm0, %v2578_v41  ;;  %v2741_v41 = vrot.slane %v86_v63, %v104_v21 }
 0x150   :  { %2177 = vmatmul.mubr.msk.bf16.gmra.mxu0 %vm198_vm0, %v2589_v50  ;;  %v2745_v50 = vrot.slane %v86_v63, %v100_v23 }
 0x151   :  { %2180 = vmatprep.mubr.msk.bf16.mxu0 %vm198_vm0, %v2600_v59 }
 0x158   :  { %2181 = vmatmul.mubr.msk.bf16.gmra.mxu0 %vm198_vm0, %v2611_v5 }
 0x1c0   :  { %v974_v59 = vpop.f32.mrf.mxu0  ;;  %v1087_v5 = vpop.f32.mrf.mxu1 }
 0x1c1   :  { %v975_v4 = vadd.f32 %v974_v59, %v2745_v50 }
 0x1c2   :  { %v976_v1 = vpop.f32.mrf.mxu0  ;;  %v1089_v2 = vpop.f32.mrf.mxu1 }
 0x1c3   :  { %v977_v3 = vadd.f32 %v976_v1, %v2741_v41  ;;  %v1088_v23 = vadd.f32 %v1087_v5, %v975_v4 }
 0x1c4   :  { %v978_v0 = vpop.f32.mrf.mxu0  ;;  %v1091_v6 = vpop.f32.mrf.mxu1 }
 0x1c5   :  { %v979_v7 = vadd.f32 %v978_v0, %v2745_v50  ;;  %v1090_v21 = vadd.f32 %v1089_v2, %v977_v3  ;;  %v1166_v24 = vmax.f32 %v1088_v23, 0.0 }
 0x1c6   :  { %v980_v8 = vpop.f32.mrf.mxu0  ;;  %v1093_v9 = vpop.f32.mrf.mxu1 }
 0x1c7   :  { %v1092_v10 = vadd.f32 %v1091_v6, %v979_v7  ;;  %v981_v20 = vadd.f32 %v980_v8, %v2741_v41  ;;  %v1167_v17 = vmax.f32 %v1090_v21, 0.0 }
 0x1c8   :  { %v984_v11 = vpop.f32.mrf.mxu0  ;;  %v1097_v12 = vpop.f32.mrf.mxu1 }
 0x1c9   :  { %v1094_v13 = vadd.f32 %v1093_v9, %v981_v20  ;;  %v1168_v14 = vmax.f32 %v1092_v10, 0.0  ;;  %v985_v25 = vadd.f32 %v984_v11, %v2745_v50 }
 0x1ca   :  { %v986_v15 = vpop.f32.mrf.mxu0  ;;  %v1099_v16 = vpop.f32.mrf.mxu1 }
 0x1cb   :  { %v1169_v19 = vmax.f32 %v1094_v13, 0.0  ;;  %v987_v22 = vadd.f32 %v986_v15, %v2741_v41  ;;  %v1198_v34 = vpack.c.bf16 %v1168_v14, %v1166_v24  ;;  %v1098_v40 = vadd.f32 %v1097_v12, %v985_v25 }
 0x1cc   :  { %v988_v26 = vpop.f32.mrf.mxu0  ;;  %v1101_v27 = vpop.f32.mrf.mxu1 }
 0x1cd   :  { %v1199_v32 = vpack.c.bf16 %v1169_v19, %v1167_v17  ;;  %v989_v33 = vadd.f32 %v988_v26, %v2745_v50  ;;  %v1100_v37 = vadd.f32 %v1099_v16, %v987_v22  ;;  %v1170_v51 = vmax.f32 %v1098_v40, 0.0 }
 0x1ce   :  { %v990_v35 = vpop.f32.mrf.mxu0  ;;  %v1103_v36 = vpop.f32.mrf.mxu1 }
 0x1cf   :  { %v1102_v38 = vadd.f32 %v1101_v27, %v989_v33  ;;  %v991_v39 = vadd.f32 %v990_v35, %v2741_v41  ;;  %1487 = vmatprep.mubr.bf16.mxu1 %v1199_v32  ;;  %v1171_v47 = vmax.f32 %v1100_v37, 0.0 }
 0x1d0   :  { %v994_v42 = vpop.f32.mrf.mxu0  ;;  %v1107_v18 = vpop.f32.mrf.mxu1  ;;  %1488 = vmatmul.mubr.bf16.vlgmr.msra.gmra.mxu1 %v1198_v34 }
 0x1d1   :  { %v1104_v43 = vadd.f32 %v1103_v36, %v991_v39  ;;  %v1172_v44 = vmax.f32 %v1102_v38, 0.0  ;;  %v995_v52 = vadd.f32 %v994_v42, %v2745_v50 }
 0x1d2   :  { %v996_v45 = vpop.f32.mrf.mxu0  ;;  %v1109_v46 = vpop.f32.mrf.mxu1 }
 0x1d3   :  { %v1173_v48 = vmax.f32 %v1104_v43, 0.0  ;;  %v997_v49 = vadd.f32 %v996_v45, %v2741_v41  ;;  %v1200_v29 = vpack.c.bf16 %v1172_v44, %v1170_v51  ;;  %v1108_v60 = vadd.f32 %v1107_v18, %v995_v52 }
 0x1d4   :  { %v998_v30 = vpop.f32.mrf.mxu0  ;;  %v1111_v53 = vpop.f32.mrf.mxu1 }
 0x1d5   :  { %v1201_v31 = vpack.c.bf16 %v1173_v48, %v1171_v47  ;;  %v999_v28 = vadd.f32 %v998_v30, %v2745_v50  ;;  %v1110_v56 = vadd.f32 %v1109_v46, %v997_v49  ;;  %v1174_v0 = vmax.f32 %v1108_v60, 0.0 }
 0x1d6   :  { %v1000_v54 = vpop.f32.mrf.mxu0  ;;  %v1113_v55 = vpop.f32.mrf.mxu1 }
 0x1d7   :  { %v1112_v57 = vadd.f32 %v1111_v53, %v999_v28  ;;  %v1001_v58 = vadd.f32 %v1000_v54, %v2741_v41  ;;  %1495 = vmatprep.mubr.bf16.mxu1 %v1201_v31  ;;  %v1175_v2 = vmax.f32 %v1110_v56, 0.0 }
 0x1d8   :  { %v1004_v61 = vpop.f32.mrf.mxu0  ;;  %v1117_v62 = vpop.f32.mrf.mxu1  ;;  %1496 = vmatmul.mubr.bf16.gmra.mxu1 %v1200_v29 }
 0x1d9   :  { %v1114_v63 = vadd.f32 %v1113_v55, %v1001_v58  ;;  %v1176_v59 = vmax.f32 %v1112_v57, 0.0  ;;  %v1005_v6 = vadd.f32 %v1004_v61, %v2745_v50 }
 0x1da   :  { %v1006_v5 = vpop.f32.mrf.mxu0  ;;  %v1119_v1 = vpop.f32.mrf.mxu1 }
 0x1db   :  { %v1177_v3 = vmax.f32 %v1114_v63, 0.0  ;;  %v1007_v4 = vadd.f32 %v1006_v5, %v2741_v41  ;;  %v1202_v10 = vpack.c.bf16 %v1176_v59, %v1174_v0  ;;  %v1118_v14 = vadd.f32 %v1117_v62, %v1005_v6 }
 0x1dc   :  { %v1008_v7 = vpop.f32.mrf.mxu0  ;;  %v1121_v8 = vpop.f32.mrf.mxu1 }
 0x1dd   :  { %v1203_v9 = vpack.c.bf16 %v1177_v3, %v1175_v2  ;;  %v1009_v21 = vadd.f32 %v1008_v7, %v2745_v50  ;;  %v1120_v11 = vadd.f32 %v1119_v1, %v1007_v4  ;;  %v1178_v32 = vmax.f32 %v1118_v14, 0.0 }
 0x1de   :  { %v1010_v20 = vpop.f32.mrf.mxu0  ;;  %v1123_v23 = vpop.f32.mrf.mxu1 }
 0x1df   :  { %v1122_v12 = vadd.f32 %v1121_v8, %v1009_v21  ;;  %v1011_v13 = vadd.f32 %v1010_v20, %v2741_v41  ;;  %1503 = vmatprep.mubr.bf16.mxu1 %v1203_v9  ;;  %v1179_v25 = vmax.f32 %v1120_v11, 0.0 }
 0x1e0   :  { %v1014_v15 = vpop.f32.mrf.mxu0  ;;  %v1127_v16 = vpop.f32.mrf.mxu1  ;;  %1504 = vmatmul.mubr.bf16.gmra.mxu1 %v1202_v10 }
 0x1e1   :  { %v1124_v17 = vadd.f32 %v1123_v23, %v1011_v13  ;;  %v1180_v19 = vmax.f32 %v1122_v12, 0.0  ;;  %v1015_v33 = vadd.f32 %v1014_v15, %v2745_v50 }
 0x1e2   :  { %v1016_v22 = vpop.f32.mrf.mxu0  ;;  %v1129_v24 = vpop.f32.mrf.mxu1 }
 0x1e3   :  { %v1181_v26 = vmax.f32 %v1124_v17, 0.0  ;;  %v1017_v27 = vadd.f32 %v1016_v22, %v2741_v41  ;;  %v1204_v38 = vpack.c.bf16 %v1180_v19, %v1178_v32  ;;  %v1128_v44 = vadd.f32 %v1127_v16, %v1015_v33 }
 0x1e4   :  { %v1018_v34 = vpop.f32.mrf.mxu0  ;;  %v1131_v35 = vpop.f32.mrf.mxu1 }
 0x1e5   :  { %v1205_v36 = vpack.c.bf16 %v1181_v26, %v1179_v25  ;;  %v1019_v37 = vadd.f32 %v1018_v34, %v2745_v50  ;;  %v1130_v42 = vadd.f32 %v1129_v24, %v1017_v27  ;;  %v1182_v31 = vmax.f32 %v1128_v44, 0.0 }
 0x1e6   :  { %v1020_v39 = vpop.f32.mrf.mxu0  ;;  %v1133_v40 = vpop.f32.mrf.mxu1 }
 0x1e7   :  { %v1132_v18 = vadd.f32 %v1131_v35, %v1019_v37  ;;  %v1021_v43 = vadd.f32 %v1020_v39, %v2741_v41  ;;  %1511 = vmatprep.mubr.bf16.mxu1 %v1205_v36  ;;  %v1183_v52 = vmax.f32 %v1130_v42, 0.0 }
 0x1e8   :  { %v1024_v45 = vpop.f32.mrf.mxu0  ;;  %v1137_v46 = vpop.f32.mrf.mxu1  ;;  %1512 = vmatmul.mubr.bf16.gmra.mxu1 %v1204_v38 }
 0x1e9   :  { %v1134_v47 = vadd.f32 %v1133_v40, %v1021_v43  ;;  %v1184_v48 = vmax.f32 %v1132_v18, 0.0  ;;  %v1025_v28 = vadd.f32 %v1024_v45, %v2745_v50 }
 0x1ea   :  { %v1026_v49 = vpop.f32.mrf.mxu0  ;;  %v1139_v51 = vpop.f32.mrf.mxu1 }
 0x1eb   :  { %v1185_v30 = vmax.f32 %v1134_v47, 0.0  ;;  %v1027_v53 = vadd.f32 %v1026_v49, %v2741_v41  ;;  %v1206_v57 = vpack.c.bf16 %v1184_v48, %v1182_v31  ;;  %v1138_v59 = vadd.f32 %v1137_v46, %v1025_v28 }
 0x1ec   :  { %v1028_v29 = vpop.f32.mrf.mxu0  ;;  %v1141_v54 = vpop.f32.mrf.mxu1 }
 0x1ed   :  { %v1207_v55 = vpack.c.bf16 %v1185_v30, %v1183_v52  ;;  %v1029_v56 = vadd.f32 %v1028_v29, %v2745_v50  ;;  %v1140_v61 = vadd.f32 %v1139_v51, %v1027_v53  ;;  %v1186_v9 = vmax.f32 %v1138_v59, 0.0  ;;  %v2362_v29 = vld [vmem:[#allocation7 + $0x20] sm:$0xff]  }
 0x1ee   :  { %v1030_v58 = vpop.f32.mrf.mxu0  ;;  %v1143_v60 = vpop.f32.mrf.mxu1 }
 0x1ef   :  { %v1142_v62 = vadd.f32 %v1141_v54, %v1029_v56  ;;  %v1031_v63 = vadd.f32 %v1030_v58, %v2741_v41  ;;  %1519 = vmatprep.mubr.bf16.mxu1 %v1207_v55  ;;  %v1187_v6 = vmax.f32 %v1140_v61, 0.0  ;;  %v2364_v54 = vld [vmem:[#allocation7 + $0x10] sm:$0xff]   ;;  %v2365_v55 = vld [vmem:[#allocation7 + $0x8] sm:$0xff]   ;;  %v2366_v56 = vld [vmem:[#allocation7] sm:$0xff]  }
 0x1f0   :  { %v1034_v5 = vpop.f32.mrf.mxu0  ;;  %v1147_v1 = vpop.f32.mrf.mxu1  ;;  %1520 = vmatmul.mubr.bf16.gmra.mxu1 %v1206_v57 }
 0x1f1   :  { %v1144_v2 = vadd.f32 %v1143_v60, %v1031_v63  ;;  %v1188_v3 = vmax.f32 %v1142_v62, 0.0  ;;  %v1035_v21 = vadd.f32 %v1034_v5, %v2745_v50 }
 0x1f2   :  { %v1036_v4 = vpop.f32.mrf.mxu0  ;;  %v1149_v0 = vpop.f32.mrf.mxu1 }
 0x1f3   :  { %v1189_v7 = vmax.f32 %v1144_v2, 0.0  ;;  %v1037_v8 = vadd.f32 %v1036_v4, %v2741_v41  ;;  %v1208_v12 = vpack.c.bf16 %v1188_v3, %v1186_v9  ;;  %v1148_v19 = vadd.f32 %v1147_v1, %v1035_v21  ;;  %v2782_v1 = vld [vmem:[%s2815_s6 + $0x6] ss:$0 sm:$0xff] }
 0x1f4   :  { %v1038_v10 = vpop.f32.mrf.mxu0  ;;  %v1151_v20 = vpop.f32.mrf.mxu1 }
 0x1f5   :  { %v1209_v23 = vpack.c.bf16 %v1189_v7, %v1187_v6  ;;  %v1039_v11 = vadd.f32 %v1038_v10, %v2745_v50  ;;  %v1150_v15 = vadd.f32 %v1149_v0, %v1037_v8  ;;  %v1190_v36 = vmax.f32 %v1148_v19, 0.0 }
 0x1f6   :  { %v1040_v13 = vpop.f32.mrf.mxu0  ;;  %v1153_v14 = vpop.f32.mrf.mxu1 }
 0x1f7   :  { %v1152_v16 = vadd.f32 %v1151_v20, %v1039_v11  ;;  %v1041_v17 = vadd.f32 %v1040_v13, %v2741_v41  ;;  %1527 = vmatprep.mubr.bf16.mxu1 %v1209_v23  ;;  %v1191_v33 = vmax.f32 %v1150_v15, 0.0 }
 0x1f8   :  { %v1044_v22 = vpop.f32.mrf.mxu0  ;;  %v1157_v24 = vpop.f32.mrf.mxu1  ;;  %1528 = vmatmul.mubr.bf16.gmra.mxu1 %v1208_v12 }
 0x1f9   :  { %v1154_v25 = vadd.f32 %v1153_v14, %v1041_v17  ;;  %v1192_v26 = vmax.f32 %v1152_v16, 0.0  ;;  %v1045_v37 = vadd.f32 %v1044_v22, %v2745_v50 }
 0x1fa   :  { %v1046_v27 = vpop.f32.mrf.mxu0  ;;  %v1159_v32 = vpop.f32.mrf.mxu1 }
 0x1fb   :  { %v1193_v34 = vmax.f32 %v1154_v25, 0.0  ;;  %v1047_v35 = vadd.f32 %v1046_v27, %v2741_v41  ;;  %v1210_v18 = vpack.c.bf16 %v1192_v26, %v1190_v36  ;;  %v1158_v47 = vadd.f32 %v1157_v24, %v1045_v37 }
 0x1fc   :  { %v1048_v38 = vpop.f32.mrf.mxu0  ;;  %v1161_v39 = vpop.f32.mrf.mxu1 }
 0x1fd   :  { %v1211_v40 = vpack.c.bf16 %v1193_v34, %v1191_v33  ;;  %v1049_v42 = vadd.f32 %v1048_v38, %v2745_v50  ;;  %v1160_v44 = vadd.f32 %v1159_v32, %v1047_v35  ;;  %v1194_v53 = vmax.f32 %v1158_v47, 0.0  ;;  %v2361_v50 = vld [vmem:[#allocation7 + $0x28] sm:$0xff]  }
 0x1fe   :  { %v1050_v43 = vpop.f32.mrf.mxu0  ;;  %v1163_v48 = vpop.f32.mrf.mxu1  ;;  %2188 = vmatprep.subr.bf16.mxu0 %v2361_v50 }
 0x1ff   :  { %v1162_v45 = vadd.f32 %v1161_v39, %v1049_v42  ;;  %v1051_v46 = vadd.f32 %v1050_v43, %v2741_v41  ;;  %1535 = vmatprep.mubr.bf16.mxu1 %v1211_v40  ;;  %v1195_v52 = vmax.f32 %v1160_v44, 0.0  ;;  %2189 = vmatpush3.bf16.msra.mxu0 %v2361_v50  ;;  %v2363_v41 = vld [vmem:[#allocation7 + $0x18] sm:$0xff]  }
 0x200   :  { %1536 = vmatmul.mubr.bf16.gmra.mxu1 %v1210_v18  ;;  %2190 = vmatprep.subr.bf16.mxu0 %v2362_v29  ;;  %v2170_v57 = vpop.f32.mrf.mxu0 }
 0x201   :  { %v1164_v49 = vadd.f32 %v1163_v48, %v1051_v46  ;;  %v1196_v51 = vmax.f32 %v1162_v45, 0.0 }
 0x202   :  { %v1296_v58 = vpop.f32.mrf.mxu0 }
 0x203   :  { %v1197_v30 = vmax.f32 %v1164_v49, 0.0  ;;  %v1212_v28 = vpack.c.bf16 %v1196_v51, %v1194_v53  ;;  %2191 = vmatpush3.bf16.msra.mxu0 %v2362_v29 }
 0x204   :  { %2192 = vmatprep.subr.bf16.mxu0 %v2363_v41  ;;  %v2171_v62 = vpop.f32.mrf.mxu0 }
 0x205   :  { %v1213_v31 = vpack.c.bf16 %v1197_v30, %v1195_v52 }
 0x206   :  { %v1299_v3 = vpop.f32.mrf.mxu0 }
 0x207   :  { %1543 = vmatprep.mubr.bf16.mxu1 %v1213_v31  ;;  %2193 = vmatpush3.bf16.msra.mxu0 %v2363_v41 }
 0x208   :  { %1544 = vmatmul.mubr.bf16.gmra.mxu1 %v1212_v28  ;;  %2194 = vmatprep.subr.bf16.mxu0 %v2364_v54  ;;  %v2174_v9 = vpop.f32.mrf.mxu0 }
 0x20a   :  { %v1312_v14 = vpop.f32.mrf.mxu0 }
 0x20b   :  { %2195 = vmatpush3.bf16.msra.mxu0 %v2364_v54 }
 0x20c   :  { %2196 = vmatprep.subr.bf16.mxu0 %v2365_v55  ;;  %v2175_v25 = vpop.f32.mrf.mxu0 }
 0x20e   :  { %v1315_v37 = vpop.f32.mrf.mxu0 }
 0x20f   :  { %2197 = vmatpush3.bf16.msra.mxu0 %v2365_v55 }
 0x210   :  { %2198 = vmatprep.subr.bf16.mxu0 %v2366_v56  ;;  %v2178_v44 = vpop.f32.mrf.mxu0 }
 0x212   :  { %v1328_v30 = vpop.f32.mrf.mxu0 }
 0x213   :  { %2199 = vmatpush3.bf16.msra.mxu0 %v2366_v56 }
 0x214   :  { %v2179_v54 = vpop.f32.mrf.mxu0 }
 0x290   :  { %v2100_v60 = vpop.f32.mrf.mxu1 }
 0x292   :  { %v2101_v61 = vpop.f32.mrf.mxu1 }
 0x293   :  { %v2102_v63 = vadd.f32 %v2101_v61, %v2100_v60 }
 0x294   :  { %v2103_v59 = vpop.f32.mrf.mxu1 }
 0x295   :  { %v1490_v5 = vadd.f32 %v2102_v63, %v1296_v58  ;;  %v1331_v63 = vpop.f32.mrf.mxu0 }
 0x296   :  { %v2104_v2 = vpop.f32.mrf.mxu1 }
 0x297   :  { %v2105_v4 = vadd.f32 %v2104_v2, %v2103_v59  ;;  %v1558_v6 = vadd.f32 %v2782_v1, %v1490_v5 }
 0x298   :  { %v2106_v0 = vpop.f32.mrf.mxu1 }
 0x299   :  { %v1493_v7 = vadd.f32 %v2105_v4, %v1299_v3  ;;  %v1574_v23 = vmax.f32 %v1558_v6, 0.0  ;;  %v2182_v6 = vpop.f32.mrf.mxu0 }
 0x29a   :  { %v2107_v8 = vpop.f32.mrf.mxu1 }
 0x29b   :  { %v1559_v21 = vadd.f32 %v2782_v1, %v1493_v7  ;;  %v2108_v10 = vadd.f32 %v2107_v8, %v2106_v0 }
 0x29c   :  { %v2109_v20 = vpop.f32.mrf.mxu1 }
 0x29d   :  { %v1575_v11 = vmax.f32 %v1559_v21, 0.0  ;;  %v1498_v12 = vadd.f32 %v2170_v57, %v2108_v10 }
 0x29e   :  { %v2110_v13 = vpop.f32.mrf.mxu1 }
 0x29f   :  { %v2111_v15 = vadd.f32 %v2110_v13, %v2109_v20  ;;  %v1590_v16 = vpack.c.bf16 %v1575_v11, %v1574_v23  ;;  %v1560_v19 = vadd.f32 %v2782_v1, %v1498_v12  ;;  %v1344_v11 = vpop.f32.mrf.mxu0 }
 0x2a0   :  { %v2112_v17 = vpop.f32.mrf.mxu1 }
 0x2a1   :  { %v1501_v22 = vadd.f32 %v2171_v62, %v2111_v15  ;;  %2200 = vmatprep.mubr.bf16.mxu0 %v1590_v16  ;;  %v1576_v33 = vmax.f32 %v1560_v19, 0.0  ;;  %v2183_v19 = vpop.f32.mrf.mxu0 }
 0x2a2   :  { %v2113_v24 = vpop.f32.mrf.mxu1 }
 0x2a3   :  { %v1561_v26 = vadd.f32 %v2782_v1, %v1501_v22  ;;  %v2114_v27 = vadd.f32 %v2113_v24, %v2112_v17 }
 0x2a4   :  { %v2115_v32 = vpop.f32.mrf.mxu1 }
 0x2a5   :  { %v1577_v34 = vmax.f32 %v1561_v26, 0.0  ;;  %v1506_v35 = vadd.f32 %v2114_v27, %v1312_v14 }
 0x2a6   :  { %v2116_v36 = vpop.f32.mrf.mxu1 }
 0x2a7   :  { %v1591_v38 = vpack.c.bf16 %v1577_v34, %v1576_v33  ;;  %v2117_v39 = vadd.f32 %v2116_v36, %v2115_v32  ;;  %v1562_v42 = vadd.f32 %v2782_v1, %v1506_v35  ;;  %v1347_v34 = vpop.f32.mrf.mxu0 }
 0x2a8   :  { %v2118_v40 = vpop.f32.mrf.mxu1 }
 0x2a9   :  { %v1509_v18 = vadd.f32 %v2117_v39, %v1315_v37  ;;  %2201 = vmatmul.mubr.bf16.vlgmr.msra.gmra.mxu0 %v1591_v38  ;;  %v1578_v48 = vmax.f32 %v1562_v42, 0.0 }
 0x2aa   :  { %v2119_v43 = vpop.f32.mrf.mxu1 }
 0x2ab   :  { %v1563_v45 = vadd.f32 %v2782_v1, %v1509_v18  ;;  %v2120_v46 = vadd.f32 %v2119_v43, %v2118_v40 }
 0x2ac   :  { %v2121_v47 = vpop.f32.mrf.mxu1 }
 0x2ad   :  { %v1579_v49 = vmax.f32 %v1563_v45, 0.0  ;;  %v1514_v51 = vadd.f32 %v2174_v9, %v2120_v46 }
 0x2ae   :  { %v2122_v52 = vpop.f32.mrf.mxu1 }
 0x2af   :  { %v2123_v53 = vadd.f32 %v2122_v52, %v2121_v47  ;;  %v1592_v31 = vpack.c.bf16 %v1579_v49, %v1578_v48  ;;  %v1564_v50 = vadd.f32 %v2782_v1, %v1514_v51 }
 0x2b0   :  { %v2124_v28 = vpop.f32.mrf.mxu1 }
 0x2b1   :  { %v1517_v29 = vadd.f32 %v2175_v25, %v2123_v53  ;;  %2204 = vmatprep.mubr.bf16.mxu0 %v1592_v31  ;;  %v1580_v58 = vmax.f32 %v1564_v50, 0.0 }
 0x2b2   :  { %v2125_v41 = vpop.f32.mrf.mxu1 }
 0x2b3   :  { %v1565_v55 = vadd.f32 %v2782_v1, %v1517_v29  ;;  %v2126_v56 = vadd.f32 %v2125_v41, %v2124_v28  ;;  %v1986_v29 = vld [vmem:[%s2815_s6 + $0x7] ss:$0 sm:$0xff]  ;;  %s2465_s6 = smov [#allocation8]  }
 0x2b4   :  { %v2127_v57 = vpop.f32.mrf.mxu1  ;;  %s1850_s2 = sshll.u32 %s2465_s6, 4  ;;  %s1851_s2 = int_to_ptr.vmem [resolvable:$true] %s1850_s2 }
 0x2b5   :  { %v1581_v60 = vmax.f32 %v1565_v55, 0.0  ;;  %v1522_v61 = vadd.f32 %v2126_v56, %v1328_v30  ;;  %s2431_s19 = scalar_lea.vmem %s1851_s2, 1024  ;;  %p2436_p2 = scmp.lt.s32.totalorder %s1851_s2, %s1851_s2 }
 0x2b6   :  { %v2128_v62 = vpop.f32.mrf.mxu1  ;;  %p2432_p1 = scmp.ne.s32.totalorder %s1851_s2, %s2431_s19  ;;  %p2437_p3 = scmp.lt.s32.totalorder %s2431_s19, %s2431_s19 }
 0x2b7   :  { %v2129_v59 = vadd.f32 %v2128_v62, %v2127_v57  ;;  %v1593_v5 = vpack.c.bf16 %v1581_v60, %v1580_v58  ;;  %v1566_v3 = vadd.f32 %v2782_v1, %v1522_v61 }
 0x2b8   :  { %v2130_v2 = vpop.f32.mrf.mxu1  ;;  %p2438_p4 = por %p2437_p3, %p2436_p2 }
 0x2b9   :  { %v1525_v4 = vadd.f32 %v2129_v59, %v1331_v63  ;;  %2205 = vmatmul.mubr.bf16.gmra.mxu0 %v1593_v5  ;;  %v1582_v21 = vmax.f32 %v1566_v3, 0.0 }
 0x2ba   :  { %v2131_v0 = vpop.f32.mrf.mxu1  ;;  %p2439_p5 = pnand %p2438_p4, %p2432_p1 }
 0x2bb   :  { %v1567_v7 = vadd.f32 %v2782_v1, %v1525_v4  ;;  %v2132_v8 = vadd.f32 %v2131_v0, %v2130_v2 }
 0x2bc   :  { %v2133_v9 = vpop.f32.mrf.mxu1 }
 0x2bd   :  { %v1583_v10 = vmax.f32 %v1567_v7, 0.0  ;;  %v1530_v20 = vadd.f32 %v2178_v44, %v2132_v8 }
 0x2be   :  { %v2134_v23 = vpop.f32.mrf.mxu1 }
 0x2bf   :  { %v2135_v12 = vadd.f32 %v2134_v23, %v2133_v9  ;;  %v1594_v13 = vpack.c.bf16 %v1583_v10, %v1582_v21  ;;  %v1568_v15 = vadd.f32 %v2782_v1, %v1530_v20 }
 0x2c0   :  { %v2136_v14 = vpop.f32.mrf.mxu1 }
 0x2c1   :  { %v1533_v16 = vadd.f32 %v2179_v54, %v2135_v12  ;;  %2208 = vmatprep.mubr.bf16.mxu0 %v1594_v13  ;;  %v1584_v26 = vmax.f32 %v1568_v15, 0.0 }
 0x2c2   :  { %v2137_v17 = vpop.f32.mrf.mxu1 }
 0x2c3   :  { %v1569_v22 = vadd.f32 %v2782_v1, %v1533_v16  ;;  %v2138_v24 = vadd.f32 %v2137_v17, %v2136_v14 }
 0x2c4   :  { %v2139_v25 = vpop.f32.mrf.mxu1 }
 0x2c5   :  { %v1585_v27 = vmax.f32 %v1569_v22, 0.0  ;;  %v1538_v32 = vadd.f32 %v2138_v24, %v1344_v11 }
 0x2c6   :  { %v2140_v33 = vpop.f32.mrf.mxu1 }
 0x2c7   :  { %v2141_v35 = vadd.f32 %v2140_v33, %v2139_v25  ;;  %v1595_v36 = vpack.c.bf16 %v1585_v27, %v1584_v26  ;;  %v1570_v38 = vadd.f32 %v2782_v1, %v1538_v32 }
 0x2c8   :  { %v2142_v37 = vpop.f32.mrf.mxu1 }
 0x2c9   :  { %v1541_v39 = vadd.f32 %v2141_v35, %v1347_v34  ;;  %2209 = vmatmul.mubr.bf16.gmra.mxu0 %v1595_v36  ;;  %v1586_v44 = vmax.f32 %v1570_v38, 0.0 }
 0x2ca   :  { %v2143_v40 = vpop.f32.mrf.mxu1 }
 0x2cb   :  { %v1571_v42 = vadd.f32 %v2782_v1, %v1541_v39  ;;  %v2144_v18 = vadd.f32 %v2143_v40, %v2142_v37 }
 0x2cc   :  { %v2145_v43 = vpop.f32.mrf.mxu1 }
 0x2cd   :  { %v1587_v45 = vmax.f32 %v1571_v42, 0.0  ;;  %v1546_v46 = vadd.f32 %v2182_v6, %v2144_v18 }
 0x2ce   :  { %v2146_v47 = vpop.f32.mrf.mxu1 }
 0x2cf   :  { %v2147_v48 = vadd.f32 %v2146_v47, %v2145_v43  ;;  %v1596_v49 = vpack.c.bf16 %v1587_v45, %v1586_v44  ;;  %v1572_v51 = vadd.f32 %v2782_v1, %v1546_v46 }
 0x2d1   :  { %v1549_v52 = vadd.f32 %v2183_v19, %v2147_v48  ;;  %2212 = vmatprep.mubr.bf16.mxu0 %v1596_v49  ;;  %v1588_v53 = vmax.f32 %v1572_v51, 0.0 }
 0x2d3   :  { %v1573_v30 = vadd.f32 %v2782_v1, %v1549_v52 }
 0x2d5   :  { %v1589_v31 = vmax.f32 %v1573_v30, 0.0 }
 0x2d7   :  { %v1597_v28 = vpack.c.bf16 %v1589_v31, %v1588_v53 }
 0x2d9   :  { %2213 = vmatmul.mubr.bf16.gmra.mxu0 %v1597_v28 }
 0x369   :  { %v2202_v50 = vpop.f32.mrf.mxu0 }
 0x36a   :  { %v1711_v55 = vadd.f32 %v2202_v50, %v1986_v29 }
 0x36b   :  { %v1702_v41 = vpop.f32.mrf.mxu0 }
 0x36c   :  { %v1703_v58 = vadd.f32 %v1986_v29, %v1702_v41 }
 0x36d   :  { %v2203_v54 = vpop.f32.mrf.mxu0 }
 0x36e   :  { %v1714_v56 = vadd.f32 %v2203_v54, %v1986_v29 }
 0x36f   :  { %v1705_v57 = vpop.f32.mrf.mxu0 }
 0x370   :  { %v2035_v60 = vpack.c.bf16 %v1714_v56, %v1711_v55  ;;  %v1706_v61 = vadd.f32 %v1986_v29, %v1705_v57 }
 0x372   :  { %2067 = vst [vmem:[#allocation8 + $0x8] sm:$0xff] %v2035_v60   ;;  %v2030_v62 = vpack.c.bf16 %v1706_v61, %v1703_v58 }
 0x374   :  { %2031 = vst [vmem:[#allocation8] sm:$0xff] %v2030_v62  }
 0x379   :  { %v2206_v1 = vpop.f32.mrf.mxu0 }
 0x37a   :  { %v1727_v5 = vadd.f32 %v2206_v1, %v1986_v29 }
 0x37b   :  { %v1718_v63 = vpop.f32.mrf.mxu0 }
 0x37c   :  { %v1719_v4 = vadd.f32 %v1986_v29, %v1718_v63 }
 0x37d   :  { %v2207_v59 = vpop.f32.mrf.mxu0 }
 0x37e   :  { %v1730_v2 = vadd.f32 %v2207_v59, %v1986_v29 }
 0x37f   :  { %v1721_v3 = vpop.f32.mrf.mxu0 }
 0x380   :  { %v2045_v0 = vpack.c.bf16 %v1730_v2, %v1727_v5  ;;  %v1722_v6 = vadd.f32 %v1986_v29, %v1721_v3 }
 0x382   :  { %2069 = vst [vmem:[#allocation8 + $0x18] sm:$0xff] %v2045_v0   ;;  %v2040_v7 = vpack.c.bf16 %v1722_v6, %v1719_v4 }
 0x384   :  { %2068 = vst [vmem:[#allocation8 + $0x10] sm:$0xff] %v2040_v7  }
 0x389   :  { %v2210_v8 = vpop.f32.mrf.mxu0 }
 0x38a   :  { %v1743_v10 = vadd.f32 %v2210_v8, %v1986_v29 }
 0x38b   :  { %v1734_v9 = vpop.f32.mrf.mxu0 }
 0x38c   :  { %v1735_v11 = vadd.f32 %v1986_v29, %v1734_v9 }
 0x38d   :  { %v2211_v21 = vpop.f32.mrf.mxu0 }
 0x38e   :  { %v1746_v20 = vadd.f32 %v2211_v21, %v1986_v29 }
 0x38f   :  { %v1737_v23 = vpop.f32.mrf.mxu0 }
 0x390   :  { %v2055_v12 = vpack.c.bf16 %v1746_v20, %v1743_v10  ;;  %v1738_v13 = vadd.f32 %v1986_v29, %v1737_v23 }
 0x392   :  { %2071 = vst [vmem:[#allocation8 + $0x28] sm:$0xff] %v2055_v12   ;;  %v2050_v14 = vpack.c.bf16 %v1738_v13, %v1735_v11 }
 0x394   :  { %2070 = vst [vmem:[#allocation8 + $0x20] sm:$0xff] %v2050_v14  }
 0x399   :  { %v2214_v15 = vpop.f32.mrf.mxu0 }
 0x39a   :  { %v1759_v19 = vadd.f32 %v2214_v15, %v1986_v29 }
 0x39b   :  { %v1750_v16 = vpop.f32.mrf.mxu0 }
 0x39c   :  { %v1751_v25 = vadd.f32 %v1986_v29, %v1750_v16 }
 0x39d   :  { %v2215_v17 = vpop.f32.mrf.mxu0 }
 0x39e   :  { %v1762_v22 = vadd.f32 %v2215_v17, %v1986_v29 }
 0x39f   :  { %v1753_v24 = vpop.f32.mrf.mxu0 }
 0x3a0   :  { %v2065_v26 = vpack.c.bf16 %v1762_v22, %v1759_v19  ;;  %v1754_v27 = vadd.f32 %v1986_v29, %v1753_v24 }
 0x3a2   :  { %2073 = vst [vmem:[#allocation8 + $0x38] sm:$0xff] %v2065_v26   ;;  %v2060_v32 = vpack.c.bf16 %v1754_v27, %v1751_v25 }
 0x3a4   :  { %2072 = vst [vmem:[#allocation8 + $0x30] sm:$0xff] %v2060_v32  }
 0x3a5   :  { %2442 = shalt.err (!%p2439_p5)
}
 0x3a6   :  { %1856 = dma.vmem_to_hbm [thread:$0]  %s1851_s2, 1024, %s2816_s7, [#allocation4], %s2458_s27, %s2458_s27, %s2459_s28  }
 0x3a7   :  { %2455 = dma.done.wait [#allocation4], 1024  }
 0x3a8   :  { %2456 = vsyncadd [#allocation4], 4294966272 }
 0x3a9   :  { %1860 = vsyncpa [#allocation3], 1 }
 0x3aa   :  { %1861 = vsyncpa [#allocation6], 1 }
 0x3ab   :  { %1862 = vsyncpa [#allocation4], 1 }

</bundles_post_ra>
